<compile_context>
chip_gen: v7x
topology: tpu7x:2x2x1
jax: 0.10.0
libtpu: 0.0.40
codegen_flags: <defaults>
</compile_context>

<pallas_src>
import functools

import jax
import jax.numpy as jnp
from jax.experimental import pallas as pl
from jax.experimental.pallas import tpu as pltpu

INPUT_DIM = 84
HIDDEN = (256, 128)
OUT_DIM = 128
BN_EPS = 1e-5


# ----------------------------------------------------------------------------- kernel
def _mlp_encoder_kernel(
    x_ref,                                   # (tile_b, 84) f32
    w1_ref, b1_ref, s1_ref, t1_ref,          # fc1: Linear (bf16 W) + folded BN affine (f32)
    wr_ref, br_ref, sr_ref, tr_ref,          # res_block: Linear (bf16 W) + folded BN affine (f32)
    w2_ref, b2_ref,                          # fc2: Linear (bf16 W); its BN folded into `out`
    wo_ref, bo_ref,                          # out: Linear (bf16 W, BN-folded)
    o_ref,                                   # (tile_b, OUT_DIM) bf16 (default) or f32
):
    # Cast to bf16 VMEM-locally — no wrapper-side HBM pad/cast copy.
    x = x_ref[...].astype(jnp.bfloat16)

    # ---- fc1: Linear -> ReLU -> BN(eval affine) -> Dropout(identity) ----
    h = jnp.dot(x, w1_ref[...], preferred_element_type=jnp.float32) + b1_ref[...]
    h = jnp.maximum(h, 0.0) * s1_ref[...] + t1_ref[...]          # f32 epilogue on the VPU

    # bf16 residual copy: halves spill traffic and doubles as the next matmul input.
    res = h.astype(jnp.bfloat16)

    # ---- res_block: Linear -> ReLU -> BN(eval) -> Dropout(identity) ----
    r = jnp.dot(res, wr_ref[...], preferred_element_type=jnp.float32) + br_ref[...]
    r = jnp.maximum(r, 0.0) * sr_ref[...] + tr_ref[...]

    # residual add + ReLU (promotes res back to f32 on the VPU)
    h = jnp.maximum(r + res, 0.0)

    # ---- fc2: Linear -> ReLU (its BN affine is folded into the output Linear) ----
    h2 = jnp.dot(h.astype(jnp.bfloat16), w2_ref[...],
                 preferred_element_type=jnp.float32) + b2_ref[...]
    h2 = jnp.maximum(h2, 0.0)

    # ---- out: Linear (fc2 BN folded in at param-prep time) ----
    o = jnp.dot(h2.astype(jnp.bfloat16), wo_ref[...],
                preferred_element_type=jnp.float32) + bo_ref[...]
    o_ref[...] = o.astype(o_ref.dtype)


# ----------------------------------------------------------------------------- wrapper
def _round_up(n, m):
    return ((n + m - 1) // m) * m


def choose_tile_b(batch):
    """Tile policy:
      * batch <= 32: one full-array block (grid=1, pure latency path).
      * otherwise: split the batch across >= 2 parallel blocks (v7x has 2 TCs),
        capped at 512-row tiles (~85% of HBM roofline vs ~63% at 256)."""
    if batch <= 32:
        return batch
    return min(512, _round_up(pl.cdiv(batch, 2), 16))


@functools.partial(jax.jit, static_argnames=("tile_b", "out_dtype", "buffered_params"))
def _mlp_encoder_call(x2d, params, tile_b, out_dtype, buffered_params):
    batch, d = x2d.shape
    ordered = [params[k] for k in
               ("w1", "b1", "s1", "t1",
                "wr", "br", "sr", "tr",
                "w2", "b2", "wo", "bo")]

    # Grid-invariant parameters: whole array as one block. Single-buffer them since
    # their block index never changes (avoids a useless second DMA buffer).
    if buffered_params:
        param_spec = lambda p: pl.BlockSpec(p.shape, lambda i: (0, 0),
                                            pipeline_mode=pl.Buffered(1))
    else:
        param_spec = lambda p: pl.BlockSpec(p.shape, lambda i: (0, 0))

    in_specs = [pl.BlockSpec((tile_b, d), lambda i: (i, 0))]     # x at native (B, 84)
    in_specs += [param_spec(p) for p in ordered]

    return pl.pallas_call(
        _mlp_encoder_kernel,
        out_shape=jax.ShapeDtypeStruct((batch, OUT_DIM), out_dtype),
        grid=(pl.cdiv(batch, tile_b),),      # partial last block handled by Pallas masking
        in_specs=in_specs,
        out_specs=pl.BlockSpec((tile_b, OUT_DIM), lambda i: (i, 0)),
        compiler_params=pltpu.CompilerParams(
            dimension_semantics=("parallel",)),
    )(x2d, *ordered)


def mlp_encoder(x, kernel_params, tile_b=None, out_dtype=jnp.bfloat16):
    """x: (B, ...) with prod(...) == INPUT_DIM. Returns (B, OUT_DIM) in `out_dtype`
    (bf16 by default; pass jnp.float32 if the consumer needs full precision)."""
    batch = x.shape[0]
    x2d = x.reshape(batch, -1)               # contiguous reshape, no HBM copy
    assert x2d.shape[1] == INPUT_DIM
    if tile_b is None:
        tile_b = choose_tile_b(batch)
    out_dtype = jnp.dtype(out_dtype)
    try:
        return _mlp_encoder_call(x2d, kernel_params, tile_b, out_dtype, True)
    except Exception:
        # Fallback if this jax version rejects pipeline_mode=pl.Buffered(1).
        return _mlp_encoder_call(x2d, kernel_params, tile_b, out_dtype, False)


# ----------------------------------------------------------------------------- params
def init_raw_params(key):
    """PyTorch-layout parameters (f32). Weights stored as (in, out). BN stats are
    randomized so the eval-mode BN fold is actually exercised."""
    def linear(k, fan_in, fan_out):
        kw, kb = jax.random.split(k)
        bound = 1.0 / jnp.sqrt(fan_in)
        w = jax.random.uniform(kw, (fan_in, fan_out), jnp.float32, -bound, bound)
        b = jax.random.uniform(kb, (1, fan_out), jnp.float32, -bound, bound)
        return w, b

    def bn(k, n):
        kg, kb, km, kv = jax.random.split(k, 4)
        return dict(
            gamma=1.0 + 0.1 * jax.random.normal(kg, (n,), jnp.float32),
            beta=0.1 * jax.random.normal(kb, (n,), jnp.float32),
            mean=0.1 * jax.random.normal(km, (n,), jnp.float32),
            var=jnp.abs(1.0 + 0.1 * jax.random.normal(kv, (n,), jnp.float32)),
        )

    k1, k2, k3, k4, k5, k6, k7 = jax.random.split(key, 7)
    w1, b1 = linear(k1, INPUT_DIM, HIDDEN[0])
    wr, br = linear(k2, HIDDEN[0], HIDDEN[0])
    w2, b2 = linear(k3, HIDDEN[0], HIDDEN[1])
    wo, bo = linear(k4, HIDDEN[1], OUT_DIM)
    return dict(w1=w1, b1=b1, wr=wr, br=br, w2=w2, b2=b2, wo=wo, bo=bo,
                bn1=bn(k5, HIDDEN[0]), bnr=bn(k6, HIDDEN[0]), bn2=bn(k7, HIDDEN[1]))


def prepare_kernel_params(p):
    """Fold BN running stats into affines, fold fc2 BN into the output Linear, and
    cast matmul weights to bf16 (biases / affines stay f32)."""
    def bn_affine(bn):
        scale = bn["gamma"] / jnp.sqrt(bn["var"] + BN_EPS)
        shift = bn["beta"] - bn["mean"] * scale
        return scale.reshape(1, -1), shift.reshape(1, -1)

    s1, t1 = bn_affine(p["bn1"])
    sr, tr = bn_affine(p["bnr"])
    s2, t2 = bn_affine(p["bn2"])

    # Fold fc2 BN (post-ReLU affine) into the output Linear.
    wo = p["wo"] * s2.reshape(-1, 1)
    bo = p["bo"] + t2 @ p["wo"]

    bf16 = lambda a: a.astype(jnp.bfloat16)
    return dict(
        w1=bf16(p["w1"]), b1=p["b1"], s1=s1, t1=t1,
        wr=bf16(p["wr"]), br=p["br"], sr=sr, tr=tr,
        w2=bf16(p["w2"]), b2=p["b2"],
        wo=bf16(wo), bo=bo,
    )


# ----------------------------------------------------------------------------- reference
def reference_forward(x, p):
    """Pure-JAX f32 eval-mode reference (unfolded BN) for a sanity check."""
    x2d = x.reshape(x.shape[0], -1).astype(jnp.float32)

    def bn(h, stats):
        return (h - stats["mean"]) / jnp.sqrt(stats["var"] + BN_EPS) * stats["gamma"] + stats["beta"]

    h = bn(jnp.maximum(x2d @ p["w1"] + p["b1"], 0.0), p["bn1"])
    res = h
    r = bn(jnp.maximum(h @ p["wr"] + p["br"], 0.0), p["bnr"])
    h = jnp.maximum(r + res, 0.0)
    h2 = bn(jnp.maximum(h @ p["w2"] + p["b2"], 0.0), p["bn2"])
    return h2 @ p["wo"] + p["bo"]


# ----------------------------------------------------------------------------- main
if __name__ == "__main__":
    key = jax.random.PRNGKey(0)
    kx, kx2, kp = jax.random.split(key, 3)

    raw = init_raw_params(kp)
    kparams = prepare_kernel_params(raw)

    # Small batch: (8, 4, 21) -> flatten to (8, 84); single full-array block (grid=1).
    x_small = jax.random.normal(kx, (8, 4, 21), jnp.float32)
    out_small = jax.block_until_ready(mlp_encoder(x_small, kparams))
    ref_small = reference_forward(x_small, raw)
    assert out_small.shape == (8, OUT_DIM)
    assert jnp.allclose(out_small.astype(jnp.float32), ref_small, atol=6e-2, rtol=5e-2), (
        float(jnp.max(jnp.abs(out_small.astype(jnp.float32) - ref_small))))

    # Non-divisible batch: 40 rows with tile_b=16 -> grid=cdiv(40,16)=3, partial last block.
    x_big = jax.random.normal(kx2, (40, 4, 21), jnp.float32)
    out_big = jax.block_until_ready(mlp_encoder(x_big, kparams, tile_b=16))
    ref_big = reference_forward(x_big, raw)
    assert out_big.shape == (40, OUT_DIM)
    assert jnp.allclose(out_big.astype(jnp.float32), ref_big, atol=6e-2, rtol=5e-2), (
        float(jnp.max(jnp.abs(out_big.astype(jnp.float32) - ref_big))))

    # Auto tiling for the same batch: tile_b=32 -> grid=2 parallel blocks (both v7x TCs).
    out_auto = jax.block_until_ready(mlp_encoder(x_big, kparams))
    assert jnp.allclose(out_auto.astype(jnp.float32), ref_big, atol=6e-2, rtol=5e-2), (
        float(jnp.max(jnp.abs(out_auto.astype(jnp.float32) - ref_big))))

    print("KERNEL_OK")
</pallas_src>

<mosaic_0001>
module attributes {stable_mosaic.version = 11 : i64} {
  func.func @_mlp_encoder_kernel(%arg0: i32, %arg1: memref<8x84xf32, #tpu.memory_space<vmem>>, %arg2: memref<84x256xbf16, #tpu.memory_space<vmem>>, %arg3: memref<1x256xf32, #tpu.memory_space<vmem>>, %arg4: memref<1x256xf32, #tpu.memory_space<vmem>>, %arg5: memref<1x256xf32, #tpu.memory_space<vmem>>, %arg6: memref<256x256xbf16, #tpu.memory_space<vmem>>, %arg7: memref<1x256xf32, #tpu.memory_space<vmem>>, %arg8: memref<1x256xf32, #tpu.memory_space<vmem>>, %arg9: memref<1x256xf32, #tpu.memory_space<vmem>>, %arg10: memref<256x128xbf16, #tpu.memory_space<vmem>>, %arg11: memref<1x128xf32, #tpu.memory_space<vmem>>, %arg12: memref<128x128xbf16, #tpu.memory_space<vmem>>, %arg13: memref<1x128xf32, #tpu.memory_space<vmem>>, %arg14: memref<8x128xbf16, #tpu.memory_space<vmem>>) attributes {dimension_semantics = [#tpu.dimension_semantics<parallel>], iteration_bounds = array<i64: 1>, scalar_prefetch = 0 : i64, scratch_operands = 0 : i64, tpu.core_type = #tpu.core_type<tc>, window_params = [{transform_indices = @transform_0, window_bounds = array<i64: 8, 84>}, {pipeline_mode = #tpu.pipeline_mode<synchronous>, transform_indices = @transform_1, window_bounds = array<i64: 84, 256>}, {pipeline_mode = #tpu.pipeline_mode<synchronous>, transform_indices = @transform_2, window_bounds = array<i64: 1, 256>}, {pipeline_mode = #tpu.pipeline_mode<synchronous>, transform_indices = @transform_3, window_bounds = array<i64: 1, 256>}, {pipeline_mode = #tpu.pipeline_mode<synchronous>, transform_indices = @transform_4, window_bounds = array<i64: 1, 256>}, {pipeline_mode = #tpu.pipeline_mode<synchronous>, transform_indices = @transform_5, window_bounds = array<i64: 256, 256>}, {pipeline_mode = #tpu.pipeline_mode<synchronous>, transform_indices = @transform_6, window_bounds = array<i64: 1, 256>}, {pipeline_mode = #tpu.pipeline_mode<synchronous>, transform_indices = @transform_7, window_bounds = array<i64: 1, 256>}, {pipeline_mode = #tpu.pipeline_mode<synchronous>, transform_indices = @transform_8, window_bounds = array<i64: 1, 256>}, {pipeline_mode = #tpu.pipeline_mode<synchronous>, transform_indices = @transform_9, window_bounds = array<i64: 256, 128>}, {pipeline_mode = #tpu.pipeline_mode<synchronous>, transform_indices = @transform_10, window_bounds = array<i64: 1, 128>}, {pipeline_mode = #tpu.pipeline_mode<synchronous>, transform_indices = @transform_11, window_bounds = array<i64: 128, 128>}, {pipeline_mode = #tpu.pipeline_mode<synchronous>, transform_indices = @transform_12, window_bounds = array<i64: 1, 128>}, {transform_indices = @transform_13, window_bounds = array<i64: 8, 128>}]} {
    %c0 = arith.constant 0 : index
    %c0_0 = arith.constant 0 : index
    %0 = vector.load %arg1[%c0, %c0_0] : memref<8x84xf32, #tpu.memory_space<vmem>>, vector<8x84xf32>
    %1 = arith.truncf %0 : vector<8x84xf32> to vector<8x84xbf16>
    %c0_1 = arith.constant 0 : index
    %c0_2 = arith.constant 0 : index
    %2 = vector.load %arg2[%c0_1, %c0_2] : memref<84x256xbf16, #tpu.memory_space<vmem>>, vector<84x256xbf16>
    %cst = arith.constant dense<0.000000e+00> : vector<8x256xf32>
    %3 = tpu.matmul %1, %2, %cst {dimension_numbers = #tpu.dot_dimension_numbers<[1], [0], [0], [1], [0, 0, 1, 1], [], []>} : vector<8x84xbf16>, vector<84x256xbf16>, vector<8x256xf32> -> vector<8x256xf32>
    %c0_3 = arith.constant 0 : index
    %c0_4 = arith.constant 0 : index
    %4 = vector.load %arg3[%c0_3, %c0_4] : memref<1x256xf32, #tpu.memory_space<vmem>>, vector<1x256xf32>
    %5 = vector.broadcast %4 : vector<1x256xf32> to vector<8x256xf32>
    %6 = arith.addf %3, %5 : vector<8x256xf32>
    %cst_5 = arith.constant 0.000000e+00 : f32
    %7 = vector.broadcast %cst_5 : f32 to vector<8x256xf32>
    %8 = arith.maximumf %6, %7 : vector<8x256xf32>
    %c0_6 = arith.constant 0 : index
    %c0_7 = arith.constant 0 : index
    %9 = vector.load %arg4[%c0_6, %c0_7] : memref<1x256xf32, #tpu.memory_space<vmem>>, vector<1x256xf32>
    %10 = vector.broadcast %9 : vector<1x256xf32> to vector<8x256xf32>
    %11 = arith.mulf %8, %10 : vector<8x256xf32>
    %c0_8 = arith.constant 0 : index
    %c0_9 = arith.constant 0 : index
    %12 = vector.load %arg5[%c0_8, %c0_9] : memref<1x256xf32, #tpu.memory_space<vmem>>, vector<1x256xf32>
    %13 = vector.broadcast %12 : vector<1x256xf32> to vector<8x256xf32>
    %14 = arith.addf %11, %13 : vector<8x256xf32>
    %15 = arith.truncf %14 : vector<8x256xf32> to vector<8x256xbf16>
    %c0_10 = arith.constant 0 : index
    %c0_11 = arith.constant 0 : index
    %16 = vector.load %arg6[%c0_10, %c0_11] : memref<256x256xbf16, #tpu.memory_space<vmem>>, vector<256x256xbf16>
    %cst_12 = arith.constant dense<0.000000e+00> : vector<8x256xf32>
    %17 = tpu.matmul %15, %16, %cst_12 {dimension_numbers = #tpu.dot_dimension_numbers<[1], [0], [0], [1], [0, 0, 1, 1], [], []>} : vector<8x256xbf16>, vector<256x256xbf16>, vector<8x256xf32> -> vector<8x256xf32>
    %c0_13 = arith.constant 0 : index
    %c0_14 = arith.constant 0 : index
    %18 = vector.load %arg7[%c0_13, %c0_14] : memref<1x256xf32, #tpu.memory_space<vmem>>, vector<1x256xf32>
    %19 = vector.broadcast %18 : vector<1x256xf32> to vector<8x256xf32>
    %20 = arith.addf %17, %19 : vector<8x256xf32>
    %cst_15 = arith.constant 0.000000e+00 : f32
    %21 = vector.broadcast %cst_15 : f32 to vector<8x256xf32>
    %22 = arith.maximumf %20, %21 : vector<8x256xf32>
    %c0_16 = arith.constant 0 : index
    %c0_17 = arith.constant 0 : index
    %23 = vector.load %arg8[%c0_16, %c0_17] : memref<1x256xf32, #tpu.memory_space<vmem>>, vector<1x256xf32>
    %24 = vector.broadcast %23 : vector<1x256xf32> to vector<8x256xf32>
    %25 = arith.mulf %22, %24 : vector<8x256xf32>
    %c0_18 = arith.constant 0 : index
    %c0_19 = arith.constant 0 : index
    %26 = vector.load %arg9[%c0_18, %c0_19] : memref<1x256xf32, #tpu.memory_space<vmem>>, vector<1x256xf32>
    %27 = vector.broadcast %26 : vector<1x256xf32> to vector<8x256xf32>
    %28 = arith.addf %25, %27 : vector<8x256xf32>
    %29 = arith.extf %15 : vector<8x256xbf16> to vector<8x256xf32>
    %30 = arith.addf %28, %29 : vector<8x256xf32>
    %cst_20 = arith.constant 0.000000e+00 : f32
    %31 = vector.broadcast %cst_20 : f32 to vector<8x256xf32>
    %32 = arith.maximumf %30, %31 : vector<8x256xf32>
    %33 = arith.truncf %32 : vector<8x256xf32> to vector<8x256xbf16>
    %c0_21 = arith.constant 0 : index
    %c0_22 = arith.constant 0 : index
    %34 = vector.load %arg10[%c0_21, %c0_22] : memref<256x128xbf16, #tpu.memory_space<vmem>>, vector<256x128xbf16>
    %cst_23 = arith.constant dense<0.000000e+00> : vector<8x128xf32>
    %35 = tpu.matmul %33, %34, %cst_23 {dimension_numbers = #tpu.dot_dimension_numbers<[1], [0], [0], [1], [0, 0, 1, 1], [], []>} : vector<8x256xbf16>, vector<256x128xbf16>, vector<8x128xf32> -> vector<8x128xf32>
    %c0_24 = arith.constant 0 : index
    %c0_25 = arith.constant 0 : index
    %36 = vector.load %arg11[%c0_24, %c0_25] : memref<1x128xf32, #tpu.memory_space<vmem>>, vector<1x128xf32>
    %37 = vector.broadcast %36 : vector<1x128xf32> to vector<8x128xf32>
    %38 = arith.addf %35, %37 : vector<8x128xf32>
    %cst_26 = arith.constant 0.000000e+00 : f32
    %39 = vector.broadcast %cst_26 : f32 to vector<8x128xf32>
    %40 = arith.maximumf %38, %39 : vector<8x128xf32>
    %41 = arith.truncf %40 : vector<8x128xf32> to vector<8x128xbf16>
    %c0_27 = arith.constant 0 : index
    %c0_28 = arith.constant 0 : index
    %42 = vector.load %arg12[%c0_27, %c0_28] : memref<128x128xbf16, #tpu.memory_space<vmem>>, vector<128x128xbf16>
    %cst_29 = arith.constant dense<0.000000e+00> : vector<8x128xf32>
    %43 = tpu.matmul %41, %42, %cst_29 {dimension_numbers = #tpu.dot_dimension_numbers<[1], [0], [0], [1], [0, 0, 1, 1], [], []>} : vector<8x128xbf16>, vector<128x128xbf16>, vector<8x128xf32> -> vector<8x128xf32>
    %c0_30 = arith.constant 0 : index
    %c0_31 = arith.constant 0 : index
    %44 = vector.load %arg13[%c0_30, %c0_31] : memref<1x128xf32, #tpu.memory_space<vmem>>, vector<1x128xf32>
    %45 = vector.broadcast %44 : vector<1x128xf32> to vector<8x128xf32>
    %46 = arith.addf %43, %45 : vector<8x128xf32>
    %47 = arith.truncf %46 : vector<8x128xf32> to vector<8x128xbf16>
    %c0_32 = arith.constant 0 : index
    %c0_33 = arith.constant 0 : index
    %48 = vector.load %arg14[%c0_32, %c0_33] : memref<8x128xbf16, #tpu.memory_space<vmem>>, vector<8x128xbf16>
    tpu.vector_store %arg14[%c0_32, %c0_33], %47 {strides = array<i32>} : memref<8x128xbf16, #tpu.memory_space<vmem>>, vector<8x128xbf16>,
    return
  }
  func.func @transform_0(%arg0: i32) -> (i32, i32) {
    %c0_i32 = arith.constant 0 : i32
    %c0_i32_0 = arith.constant 0 : i32
    return %arg0, %c0_i32 : i32, i32
  }
  func.func @transform_1(%arg0: i32) -> (i32, i32) {
    %c0_i32 = arith.constant 0 : i32
    %c0_i32_0 = arith.constant 0 : i32
    %c0_i32_1 = arith.constant 0 : i32
    return %c0_i32, %c0_i32_0 : i32, i32
  }
  func.func @transform_2(%arg0: i32) -> (i32, i32) {
    %c0_i32 = arith.constant 0 : i32
    %c0_i32_0 = arith.constant 0 : i32
    %c0_i32_1 = arith.constant 0 : i32
    return %c0_i32, %c0_i32_0 : i32, i32
  }
  func.func @transform_3(%arg0: i32) -> (i32, i32) {
    %c0_i32 = arith.constant 0 : i32
    %c0_i32_0 = arith.constant 0 : i32
    %c0_i32_1 = arith.constant 0 : i32
    return %c0_i32, %c0_i32_0 : i32, i32
  }
  func.func @transform_4(%arg0: i32) -> (i32, i32) {
    %c0_i32 = arith.constant 0 : i32
    %c0_i32_0 = arith.constant 0 : i32
    %c0_i32_1 = arith.constant 0 : i32
    return %c0_i32, %c0_i32_0 : i32, i32
  }
  func.func @transform_5(%arg0: i32) -> (i32, i32) {
    %c0_i32 = arith.constant 0 : i32
    %c0_i32_0 = arith.constant 0 : i32
    %c0_i32_1 = arith.constant 0 : i32
    return %c0_i32, %c0_i32_0 : i32, i32
  }
  func.func @transform_6(%arg0: i32) -> (i32, i32) {
    %c0_i32 = arith.constant 0 : i32
    %c0_i32_0 = arith.constant 0 : i32
    %c0_i32_1 = arith.constant 0 : i32
    return %c0_i32, %c0_i32_0 : i32, i32
  }
  func.func @transform_7(%arg0: i32) -> (i32, i32) {
    %c0_i32 = arith.constant 0 : i32
    %c0_i32_0 = arith.constant 0 : i32
    %c0_i32_1 = arith.constant 0 : i32
    return %c0_i32, %c0_i32_0 : i32, i32
  }
  func.func @transform_8(%arg0: i32) -> (i32, i32) {
    %c0_i32 = arith.constant 0 : i32
    %c0_i32_0 = arith.constant 0 : i32
    %c0_i32_1 = arith.constant 0 : i32
    return %c0_i32, %c0_i32_0 : i32, i32
  }
  func.func @transform_9(%arg0: i32) -> (i32, i32) {
    %c0_i32 = arith.constant 0 : i32
    %c0_i32_0 = arith.constant 0 : i32
    %c0_i32_1 = arith.constant 0 : i32
    return %c0_i32, %c0_i32_0 : i32, i32
  }
  func.func @transform_10(%arg0: i32) -> (i32, i32) {
    %c0_i32 = arith.constant 0 : i32
    %c0_i32_0 = arith.constant 0 : i32
    %c0_i32_1 = arith.constant 0 : i32
    return %c0_i32, %c0_i32_0 : i32, i32
  }
  func.func @transform_11(%arg0: i32) -> (i32, i32) {
    %c0_i32 = arith.constant 0 : i32
    %c0_i32_0 = arith.constant 0 : i32
    %c0_i32_1 = arith.constant 0 : i32
    return %c0_i32, %c0_i32_0 : i32, i32
  }
  func.func @transform_12(%arg0: i32) -> (i32, i32) {
    %c0_i32 = arith.constant 0 : i32
    %c0_i32_0 = arith.constant 0 : i32
    %c0_i32_1 = arith.constant 0 : i32
    return %c0_i32, %c0_i32_0 : i32, i32
  }
  func.func @transform_13(%arg0: i32) -> (i32, i32) {
    %c0_i32 = arith.constant 0 : i32
    %c0_i32_0 = arith.constant 0 : i32
    return %arg0, %c0_i32 : i32, i32
  }
}

module attributes {stable_mosaic.version = 11 : i64} {
  func.func @_mlp_encoder_kernel(%arg0: i32, %arg1: memref<8x84xf32, #tpu.memory_space<vmem>>, %arg2: memref<84x256xbf16, #tpu.memory_space<vmem>>, %arg3: memref<1x256xf32, #tpu.memory_space<vmem>>, %arg4: memref<1x256xf32, #tpu.memory_space<vmem>>, %arg5: memref<1x256xf32, #tpu.memory_space<vmem>>, %arg6: memref<256x256xbf16, #tpu.memory_space<vmem>>, %arg7: memref<1x256xf32, #tpu.memory_space<vmem>>, %arg8: memref<1x256xf32, #tpu.memory_space<vmem>>, %arg9: memref<1x256xf32, #tpu.memory_space<vmem>>, %arg10: memref<256x128xbf16, #tpu.memory_space<vmem>>, %arg11: memref<1x128xf32, #tpu.memory_space<vmem>>, %arg12: memref<128x128xbf16, #tpu.memory_space<vmem>>, %arg13: memref<1x128xf32, #tpu.memory_space<vmem>>, %arg14: memref<8x128xbf16, #tpu.memory_space<vmem>>) attributes {dimension_semantics = [#tpu.dimension_semantics<parallel>], iteration_bounds = array<i64: 1>, scalar_prefetch = 0 : i64, scratch_operands = 0 : i64, tpu.core_type = #tpu.core_type<tc>, window_params = [{transform_indices = @transform_0, window_bounds = array<i64: 8, 84>}, {pipeline_mode = #tpu.pipeline_mode<synchronous>, transform_indices = @transform_1, window_bounds = array<i64: 84, 256>}, {pipeline_mode = #tpu.pipeline_mode<synchronous>, transform_indices = @transform_2, window_bounds = array<i64: 1, 256>}, {pipeline_mode = #tpu.pipeline_mode<synchronous>, transform_indices = @transform_3, window_bounds = array<i64: 1, 256>}, {pipeline_mode = #tpu.pipeline_mode<synchronous>, transform_indices = @transform_4, window_bounds = array<i64: 1, 256>}, {pipeline_mode = #tpu.pipeline_mode<synchronous>, transform_indices = @transform_5, window_bounds = array<i64: 256, 256>}, {pipeline_mode = #tpu.pipeline_mode<synchronous>, transform_indices = @transform_6, window_bounds = array<i64: 1, 256>}, {pipeline_mode = #tpu.pipeline_mode<synchronous>, transform_indices = @transform_7, window_bounds = array<i64: 1, 256>}, {pipeline_mode = #tpu.pipeline_mode<synchronous>, transform_indices = @transform_8, window_bounds = array<i64: 1, 256>}, {pipeline_mode = #tpu.pipeline_mode<synchronous>, transform_indices = @transform_9, window_bounds = array<i64: 256, 128>}, {pipeline_mode = #tpu.pipeline_mode<synchronous>, transform_indices = @transform_10, window_bounds = array<i64: 1, 128>}, {pipeline_mode = #tpu.pipeline_mode<synchronous>, transform_indices = @transform_11, window_bounds = array<i64: 128, 128>}, {pipeline_mode = #tpu.pipeline_mode<synchronous>, transform_indices = @transform_12, window_bounds = array<i64: 1, 128>}, {transform_indices = @transform_13, window_bounds = array<i64: 8, 128>}]} {
    %c0 = arith.constant 0 : index
    %c0_0 = arith.constant 0 : index
    %0 = vector.load %arg1[%c0, %c0_0] : memref<8x84xf32, #tpu.memory_space<vmem>>, vector<8x84xf32>
    %1 = arith.truncf %0 : vector<8x84xf32> to vector<8x84xbf16>
    %c0_1 = arith.constant 0 : index
    %c0_2 = arith.constant 0 : index
    %2 = vector.load %arg2[%c0_1, %c0_2] : memref<84x256xbf16, #tpu.memory_space<vmem>>, vector<84x256xbf16>
    %cst = arith.constant dense<0.000000e+00> : vector<8x256xf32>
    %3 = tpu.matmul %1, %2, %cst {dimension_numbers = #tpu.dot_dimension_numbers<[1], [0], [0], [1], [0, 0, 1, 1], [], []>} : vector<8x84xbf16>, vector<84x256xbf16>, vector<8x256xf32> -> vector<8x256xf32>
    %c0_3 = arith.constant 0 : index
    %c0_4 = arith.constant 0 : index
    %4 = vector.load %arg3[%c0_3, %c0_4] : memref<1x256xf32, #tpu.memory_space<vmem>>, vector<1x256xf32>
    %5 = vector.broadcast %4 : vector<1x256xf32> to vector<8x256xf32>
    %6 = arith.addf %3, %5 : vector<8x256xf32>
    %cst_5 = arith.constant 0.000000e+00 : f32
    %7 = vector.broadcast %cst_5 : f32 to vector<8x256xf32>
    %8 = arith.maximumf %6, %7 : vector<8x256xf32>
    %c0_6 = arith.constant 0 : index
    %c0_7 = arith.constant 0 : index
    %9 = vector.load %arg4[%c0_6, %c0_7] : memref<1x256xf32, #tpu.memory_space<vmem>>, vector<1x256xf32>
    %10 = vector.broadcast %9 : vector<1x256xf32> to vector<8x256xf32>
    %11 = arith.mulf %8, %10 : vector<8x256xf32>
    %c0_8 = arith.constant 0 : index
    %c0_9 = arith.constant 0 : index
    %12 = vector.load %arg5[%c0_8, %c0_9] : memref<1x256xf32, #tpu.memory_space<vmem>>, vector<1x256xf32>
    %13 = vector.broadcast %12 : vector<1x256xf32> to vector<8x256xf32>
    %14 = arith.addf %11, %13 : vector<8x256xf32>
    %15 = arith.truncf %14 : vector<8x256xf32> to vector<8x256xbf16>
    %c0_10 = arith.constant 0 : index
    %c0_11 = arith.constant 0 : index
    %16 = vector.load %arg6[%c0_10, %c0_11] : memref<256x256xbf16, #tpu.memory_space<vmem>>, vector<256x256xbf16>
    %cst_12 = arith.constant dense<0.000000e+00> : vector<8x256xf32>
    %17 = tpu.matmul %15, %16, %cst_12 {dimension_numbers = #tpu.dot_dimension_numbers<[1], [0], [0], [1], [0, 0, 1, 1], [], []>} : vector<8x256xbf16>, vector<256x256xbf16>, vector<8x256xf32> -> vector<8x256xf32>
    %c0_13 = arith.constant 0 : index
    %c0_14 = arith.constant 0 : index
    %18 = vector.load %arg7[%c0_13, %c0_14] : memref<1x256xf32, #tpu.memory_space<vmem>>, vector<1x256xf32>
    %19 = vector.broadcast %18 : vector<1x256xf32> to vector<8x256xf32>
    %20 = arith.addf %17, %19 : vector<8x256xf32>
    %cst_15 = arith.constant 0.000000e+00 : f32
    %21 = vector.broadcast %cst_15 : f32 to vector<8x256xf32>
    %22 = arith.maximumf %20, %21 : vector<8x256xf32>
    %c0_16 = arith.constant 0 : index
    %c0_17 = arith.constant 0 : index
    %23 = vector.load %arg8[%c0_16, %c0_17] : memref<1x256xf32, #tpu.memory_space<vmem>>, vector<1x256xf32>
    %24 = vector.broadcast %23 : vector<1x256xf32> to vector<8x256xf32>
    %25 = arith.mulf %22, %24 : vector<8x256xf32>
    %c0_18 = arith.constant 0 : index
    %c0_19 = arith.constant 0 : index
    %26 = vector.load %arg9[%c0_18, %c0_19] : memref<1x256xf32, #tpu.memory_space<vmem>>, vector<1x256xf32>
    %27 = vector.broadcast %26 : vector<1x256xf32> to vector<8x256xf32>
    %28 = arith.addf %25, %27 : vector<8x256xf32>
    %29 = arith.extf %15 : vector<8x256xbf16> to vector<8x256xf32>
    %30 = arith.addf %28, %29 : vector<8x256xf32>
    %cst_20 = arith.constant 0.000000e+00 : f32
    %31 = vector.broadcast %cst_20 : f32 to vector<8x256xf32>
    %32 = arith.maximumf %30, %31 : vector<8x256xf32>
    %33 = arith.truncf %32 : vector<8x256xf32> to vector<8x256xbf16>
    %c0_21 = arith.constant 0 : index
    %c0_22 = arith.constant 0 : index
    %34 = vector.load %arg10[%c0_21, %c0_22] : memref<256x128xbf16, #tpu.memory_space<vmem>>, vector<256x128xbf16>
    %cst_23 = arith.constant dense<0.000000e+00> : vector<8x128xf32>
    %35 = tpu.matmul %33, %34, %cst_23 {dimension_numbers = #tpu.dot_dimension_numbers<[1], [0], [0], [1], [0, 0, 1, 1], [], []>} : vector<8x256xbf16>, vector<256x128xbf16>, vector<8x128xf32> -> vector<8x128xf32>
    %c0_24 = arith.constant 0 : index
    %c0_25 = arith.constant 0 : index
    %36 = vector.load %arg11[%c0_24, %c0_25] : memref<1x128xf32, #tpu.memory_space<vmem>>, vector<1x128xf32>
    %37 = vector.broadcast %36 : vector<1x128xf32> to vector<8x128xf32>
    %38 = arith.addf %35, %37 : vector<8x128xf32>
    %cst_26 = arith.constant 0.000000e+00 : f32
    %39 = vector.broadcast %cst_26 : f32 to vector<8x128xf32>
    %40 = arith.maximumf %38, %39 : vector<8x128xf32>
    %41 = arith.truncf %40 : vector<8x128xf32> to vector<8x128xbf16>
    %c0_27 = arith.constant 0 : index
    %c0_28 = arith.constant 0 : index
    %42 = vector.load %arg12[%c0_27, %c0_28] : memref<128x128xbf16, #tpu.memory_space<vmem>>, vector<128x128xbf16>
    %cst_29 = arith.constant dense<0.000000e+00> : vector<8x128xf32>
    %43 = tpu.matmul %41, %42, %cst_29 {dimension_numbers = #tpu.dot_dimension_numbers<[1], [0], [0], [1], [0, 0, 1, 1], [], []>} : vector<8x128xbf16>, vector<128x128xbf16>, vector<8x128xf32> -> vector<8x128xf32>
    %c0_30 = arith.constant 0 : index
    %c0_31 = arith.constant 0 : index
    %44 = vector.load %arg13[%c0_30, %c0_31] : memref<1x128xf32, #tpu.memory_space<vmem>>, vector<1x128xf32>
    %45 = vector.broadcast %44 : vector<1x128xf32> to vector<8x128xf32>
    %46 = arith.addf %43, %45 : vector<8x128xf32>
    %47 = arith.truncf %46 : vector<8x128xf32> to vector<8x128xbf16>
    %c0_32 = arith.constant 0 : index
    %c0_33 = arith.constant 0 : index
    %48 = vector.load %arg14[%c0_32, %c0_33] : memref<8x128xbf16, #tpu.memory_space<vmem>>, vector<8x128xbf16>
    tpu.vector_store %arg14[%c0_32, %c0_33], %47 {strides = array<i32>} : memref<8x128xbf16, #tpu.memory_space<vmem>>, vector<8x128xbf16>,
    return
  }
  func.func @transform_0(%arg0: i32) -> (i32, i32) {
    %c0_i32 = arith.constant 0 : i32
    %c0_i32_0 = arith.constant 0 : i32
    return %arg0, %c0_i32 : i32, i32
  }
  func.func @transform_1(%arg0: i32) -> (i32, i32) {
    %c0_i32 = arith.constant 0 : i32
    %c0_i32_0 = arith.constant 0 : i32
    %c0_i32_1 = arith.constant 0 : i32
    return %c0_i32, %c0_i32_0 : i32, i32
  }
  func.func @transform_2(%arg0: i32) -> (i32, i32) {
    %c0_i32 = arith.constant 0 : i32
    %c0_i32_0 = arith.constant 0 : i32
    %c0_i32_1 = arith.constant 0 : i32
    return %c0_i32, %c0_i32_0 : i32, i32
  }
  func.func @transform_3(%arg0: i32) -> (i32, i32) {
    %c0_i32 = arith.constant 0 : i32
    %c0_i32_0 = arith.constant 0 : i32
    %c0_i32_1 = arith.constant 0 : i32
    return %c0_i32, %c0_i32_0 : i32, i32
  }
  func.func @transform_4(%arg0: i32) -> (i32, i32) {
    %c0_i32 = arith.constant 0 : i32
    %c0_i32_0 = arith.constant 0 : i32
    %c0_i32_1 = arith.constant 0 : i32
    return %c0_i32, %c0_i32_0 : i32, i32
  }
  func.func @transform_5(%arg0: i32) -> (i32, i32) {
    %c0_i32 = arith.constant 0 : i32
    %c0_i32_0 = arith.constant 0 : i32
    %c0_i32_1 = arith.constant 0 : i32
    return %c0_i32, %c0_i32_0 : i32, i32
  }
  func.func @transform_6(%arg0: i32) -> (i32, i32) {
    %c0_i32 = arith.constant 0 : i32
    %c0_i32_0 = arith.constant 0 : i32
    %c0_i32_1 = arith.constant 0 : i32
    return %c0_i32, %c0_i32_0 : i32, i32
  }
  func.func @transform_7(%arg0: i32) -> (i32, i32) {
    %c0_i32 = arith.constant 0 : i32
    %c0_i32_0 = arith.constant 0 : i32
    %c0_i32_1 = arith.constant 0 : i32
    return %c0_i32, %c0_i32_0 : i32, i32
  }
  func.func @transform_8(%arg0: i32) -> (i32, i32) {
    %c0_i32 = arith.constant 0 : i32
    %c0_i32_0 = arith.constant 0 : i32
    %c0_i32_1 = arith.constant 0 : i32
    return %c0_i32, %c0_i32_0 : i32, i32
  }
  func.func @transform_9(%arg0: i32) -> (i32, i32) {
    %c0_i32 = arith.constant 0 : i32
    %c0_i32_0 = arith.constant 0 : i32
    %c0_i32_1 = arith.constant 0 : i32
    return %c0_i32, %c0_i32_0 : i32, i32
  }
  func.func @transform_10(%arg0: i32) -> (i32, i32) {
    %c0_i32 = arith.constant 0 : i32
    %c0_i32_0 = arith.constant 0 : i32
    %c0_i32_1 = arith.constant 0 : i32
    return %c0_i32, %c0_i32_0 : i32, i32
  }
  func.func @transform_11(%arg0: i32) -> (i32, i32) {
    %c0_i32 = arith.constant 0 : i32
    %c0_i32_0 = arith.constant 0 : i32
    %c0_i32_1 = arith.constant 0 : i32
    return %c0_i32, %c0_i32_0 : i32, i32
  }
  func.func @transform_12(%arg0: i32) -> (i32, i32) {
    %c0_i32 = arith.constant 0 : i32
    %c0_i32_0 = arith.constant 0 : i32
    %c0_i32_1 = arith.constant 0 : i32
    return %c0_i32, %c0_i32_0 : i32, i32
  }
  func.func @transform_13(%arg0: i32) -> (i32, i32) {
    %c0_i32 = arith.constant 0 : i32
    %c0_i32_0 = arith.constant 0 : i32
    return %arg0, %c0_i32 : i32, i32
  }
}

</mosaic_0001>

<bundles_post_ra>
// kernel: _mlp_encoder_call.1
= control target key start
LH: loop header
LB: loop body
LE: loop exit
PB: predicated region body
PF: predicated region fallthrough
CT: control target
= control target key end

     0   :  { %18 = vsyncpa [#allocation3], 0  ;;  %s1493_s0 = inlined_call_operand.hbm [shape: f32[8,84], index: 0, kind: input, shape index: {}]   ;;  %s1494_s1 = inlined_call_operand.hbm [shape: bf16[84,256], index: 1, kind: input, shape index: {}]   ;;  %s1495_s2 = inlined_call_operand.vmem [shape: f32[1,256], index: 2, kind: input, shape index: {}]   ;;  %s1496_s3 = inlined_call_operand.vmem [shape: f32[1,256], index: 3, kind: input, shape index: {}]   ;;  %s1497_s4 = inlined_call_operand.vmem [shape: f32[1,256], index: 4, kind: input, shape index: {}]   ;;  %s1498_s5 = inlined_call_operand.hbm [shape: bf16[256,256], index: 5, kind: input, shape index: {}]   ;;  %s1499_s6 = inlined_call_operand.vmem [shape: f32[1,256], index: 6, kind: input, shape index: {}]   ;;  %s1500_s7 = inlined_call_operand.vmem [shape: f32[1,256], index: 7, kind: input, shape index: {}]   ;;  %s1501_s8 = inlined_call_operand.vmem [shape: f32[1,256], index: 8, kind: input, shape index: {}]   ;;  %s1502_s9 = inlined_call_operand.hbm [shape: bf16[256,128], index: 9, kind: input, shape index: {}]   ;;  %s1503_s10 = inlined_call_operand.vmem [shape: f32[1,128], index: 10, kind: input, shape index: {}]   ;;  %s1504_s11 = inlined_call_operand.hbm [shape: bf16[128,128], index: 11, kind: input, shape index: {}]   ;;  %s1505_s12 = inlined_call_operand.hbm [shape: f32[1,128], index: 12, kind: input, shape index: {}]   ;;  %s1506_s13 = inlined_call_operand.hbm [shape: bf16[8,128], index: 13, kind: output, shape index: {}]  }
   0x1   :  { %19 = vsyncpa [#allocation6], 0 }
   0x2   :  { %20 = vsyncpa [#allocation9], 0 }
   0x3   :  { %21 = vsyncpa [#allocation12], 0 }
   0x4   :  { %22 = vsyncpa [#allocation4], 0  ;;  %s1269_s25 = smov [#allocation5]   ;;  %s1105_s29 = scalar_lea.hbm %s1494_s1, 1408 }
   0x5   :  { %s38_s26 = sshll.u32 %s1269_s25, 4  ;;  %p1106_p0 = scmp.ne.s32.totalorder %s1494_s1, %s1105_s29  ;;  %s39_s26 = int_to_ptr.vmem [resolvable:$true] %s38_s26 }
   0x6   :  { %p1109_p1 = scmp.lt.u32.totalorder %s1105_s29, %s1494_s1 }
   0x8   :  { %p1111_p2 = pnand %p1109_p1, %p1106_p0 }
   0xa   :  { %1114 = shalt.err (!%p1111_p2)
}
   0xb   :  { %s1115_s17 = scalar_lea.vmem %s39_s26, 1408  ;;  %p1120_p4 = scmp.lt.s32.totalorder %s39_s26, %s39_s26 }
   0xc   :  { %p1116_p3 = scmp.ne.s32.totalorder %s39_s26, %s1115_s17  ;;  %p1121_p5 = scmp.lt.s32.totalorder %s1115_s17, %s1115_s17 }
   0xe   :  { %p1122_p6 = por %p1121_p5, %p1120_p4 }
  0x10   :  { %p1123_p7 = pnand %p1122_p6, %p1116_p3 }
  0x12   :  { %1126 = shalt.err (!%p1123_p7)
}
  0x13   :  { %s1270_s18 = smov 128   ;;  %s1271_s19 = smov 8  }
  0x14   :  { %44 = dma.hbm_to_vmem [thread:$0]  %s1494_s1, 1408, %s39_s26, [#allocation6], %s1270_s18, %s1270_s18, %s1271_s19  }
  0x15   :  { %s1272_s22 = smov [#allocation8]   ;;  %s1127_s27 = scalar_lea.hbm %s1502_s9, 2048 }
  0x16   :  { %s74_s23 = sshll.u32 %s1272_s22, 4  ;;  %p1128_p8 = scmp.ne.s32.totalorder %s1502_s9, %s1127_s27  ;;  %s75_s23 = int_to_ptr.vmem [resolvable:$true] %s74_s23 }
  0x17   :  { %p1131_p9 = scmp.lt.u32.totalorder %s1127_s27, %s1502_s9 }
  0x19   :  { %p1133_p10 = pnand %p1131_p9, %p1128_p8 }
  0x1b   :  { %1136 = shalt.err (!%p1133_p10)
}
  0x1c   :  { %s1137_s15 = scalar_lea.vmem %s75_s23, 2048  ;;  %p1142_p12 = scmp.lt.s32.totalorder %s75_s23, %s75_s23 }
  0x1d   :  { %p1138_p11 = scmp.ne.s32.totalorder %s75_s23, %s1137_s15  ;;  %p1143_p13 = scmp.lt.s32.totalorder %s1137_s15, %s1137_s15 }
  0x1f   :  { %p1144_p0 = por %p1143_p13, %p1142_p12 }
  0x21   :  { %p1145_p1 = pnand %p1144_p0, %p1138_p11 }
  0x23   :  { %1148 = shalt.err (!%p1145_p1)
}
  0x24   :  { %s1273_s1 = smov 64   ;;  %s1274_s26 = smov 4  }
  0x25   :  { %80 = dma.hbm_to_vmem [thread:$0]  %s1502_s9, 2048, %s75_s23, [#allocation9], %s1273_s1, %s1273_s1, %s1274_s26  }
  0x26   :  { %s1275_s20 = smov [#allocation2]   ;;  %s1276_s22 = smov [#allocation7]  }
  0x27   :  { %s29_s21 = sshll.u32 %s1275_s20, 4  ;;  %s56_s24 = sshll.u32 %s1276_s22, 4  ;;  %s30_s21 = int_to_ptr.vmem [resolvable:$true] %s29_s21  ;;  %s1383_s24 = int_to_ptr.vmem [resolvable:$true] %s56_s24 }
  0x28   :  { %s1149_s28 = scalar_lea.hbm %s1493_s0, 128 }
  0x29   :  { %p1150_p2 = scmp.ne.s32.totalorder %s1493_s0, %s1149_s28  ;;  %p1153_p3 = scmp.lt.u32.totalorder %s1149_s28, %s1493_s0 }
  0x2b   :  { %p1155_p4 = pnand %p1153_p3, %p1150_p2 }
  0x2d   :  { %1158 = shalt.err (!%p1155_p4)
}
  0x2e   :  { %s1159_s9 = scalar_lea.vmem %s30_s21, 128  ;;  %p1164_p6 = scmp.lt.s32.totalorder %s30_s21, %s30_s21 }
  0x2f   :  { %p1160_p5 = scmp.ne.s32.totalorder %s30_s21, %s1159_s9  ;;  %p1165_p7 = scmp.lt.s32.totalorder %s1159_s9, %s1159_s9 }
  0x31   :  { %p1166_p8 = por %p1165_p7, %p1164_p6 }
  0x33   :  { %p1167_p9 = pnand %p1166_p8, %p1160_p5 }
  0x35   :  { %1170 = shalt.err (!%p1167_p9)
}
  0x36   :  { %32 = dma.hbm_to_vmem [thread:$0]  %s1493_s0, 128, %s30_s21, [#allocation3]  }
  0x37   :  { %s1171_s22 = scalar_lea.hbm %s1498_s5, 4096 }
  0x38   :  { %p1172_p10 = scmp.ne.s32.totalorder %s1498_s5, %s1171_s22  ;;  %p1175_p11 = scmp.lt.u32.totalorder %s1171_s22, %s1498_s5 }
  0x3a   :  { %p1177_p12 = pnand %p1175_p11, %p1172_p10 }
  0x3c   :  { %1180 = shalt.err (!%p1177_p12)
}
  0x3d   :  { %s1181_s30 = scalar_lea.vmem %s1383_s24, 4096  ;;  %p1186_p0 = scmp.lt.s32.totalorder %s1383_s24, %s1383_s24 }
  0x3e   :  { %p1182_p13 = scmp.ne.s32.totalorder %s1383_s24, %s1181_s30  ;;  %p1187_p1 = scmp.lt.s32.totalorder %s1181_s30, %s1181_s30 }
  0x40   :  { %p1188_p2 = por %p1187_p1, %p1186_p0 }
  0x42   :  { %p1189_p3 = pnand %p1188_p2, %p1182_p13 }
  0x44   :  { %1192 = shalt.err (!%p1189_p3)
}
  0x45   :  { %62 = dma.hbm_to_vmem [thread:$0]  %s1498_s5, 4096, %s1383_s24, [#allocation6], %s1270_s18, %s1270_s18, %s1271_s19  }
  0x46   :  { %s1277_s14 = smov [#allocation10]   ;;  %s1278_s9 = smov [#allocation11]  }
  0x47   :  { %s88_s15 = sshll.u32 %s1277_s14, 4  ;;  %s101_s23 = sshll.u32 %s1278_s9, 4  ;;  %s89_s15 = int_to_ptr.vmem [resolvable:$true] %s88_s15  ;;  %s102_s23 = int_to_ptr.vmem [resolvable:$true] %s101_s23 }
  0x48   :  { %s1193_s20 = scalar_lea.hbm %s1504_s11, 1024 }
  0x49   :  { %p1194_p4 = scmp.ne.s32.totalorder %s1504_s11, %s1193_s20  ;;  %p1197_p5 = scmp.lt.u32.totalorder %s1193_s20, %s1504_s11 }
  0x4b   :  { %p1199_p6 = pnand %p1197_p5, %p1194_p4 }
  0x4d   :  { %1202 = shalt.err (!%p1199_p6)
}
  0x4e   :  { %s1203_s5 = scalar_lea.vmem %s89_s15, 1024  ;;  %p1208_p8 = scmp.lt.s32.totalorder %s89_s15, %s89_s15 }
  0x4f   :  { %p1204_p7 = scmp.ne.s32.totalorder %s89_s15, %s1203_s5  ;;  %p1209_p9 = scmp.lt.s32.totalorder %s1203_s5, %s1203_s5 }
  0x51   :  { %p1210_p10 = por %p1209_p9, %p1208_p8 }
  0x53   :  { %p1211_p11 = pnand %p1210_p10, %p1204_p7 }
  0x55   :  { %1214 = shalt.err (!%p1211_p11)
}
  0x56   :  { %94 = dma.hbm_to_vmem [thread:$0]  %s1504_s11, 1024, %s89_s15, [#allocation9], %s1273_s1, %s1273_s1, %s1274_s26  }
  0x57   :  { %s1215_s30 = scalar_lea.hbm %s1505_s12, 16 }
  0x58   :  { %p1216_p12 = scmp.ne.s32.totalorder %s1505_s12, %s1215_s30  ;;  %p1219_p13 = scmp.lt.u32.totalorder %s1215_s30, %s1505_s12 }
  0x5a   :  { %p1221_p0 = pnand %p1219_p13, %p1216_p12 }
  0x5c   :  { %1224 = shalt.err (!%p1221_p0)
}
  0x5d   :  { %s1225_s16 = scalar_lea.vmem %s102_s23, 16  ;;  %s1229_s17 = scalar_lea.vmem %s102_s23, 32 }
  0x5e   :  { %p1226_p1 = scmp.ne.s32.totalorder %s102_s23, %s1225_s16  ;;  %p1230_p2 = scmp.lt.s32.totalorder %s102_s23, %s102_s23 }
  0x5f   :  { %p1231_p3 = scmp.lt.s32.totalorder %s1229_s17, %s1225_s16 }
  0x61   :  { %p1232_p4 = por %p1231_p3, %p1230_p2 }
  0x63   :  { %p1233_p5 = pnand %p1232_p4, %p1226_p1 }
  0x65   :  { %1236 = shalt.err (!%p1233_p5)
}
  0x66   :  { %104 = dma.hbm_to_vmem [thread:$0]  %s1505_s12, 16, %s102_s23, [#allocation12]  }
  0x67   :  { %1259 = dma.done.wait [#allocation3], 128  }
  0x68   :  { %1260 = vsyncadd [#allocation3], 4294967168 }
  0x69   :  { %1261 = dma.done.wait [#allocation6], 5504  }
  0x6a   :  { %1262 = vsyncadd [#allocation6], 4294961792 }
  0x6b   :  { %1263 = dma.done.wait [#allocation9], 3072  }
  0x6c   :  { %1264 = vsyncadd [#allocation9], 4294964224 }
  0x6d   :  { %1265 = dma.done.wait [#allocation12], 16  }
  0x6e   :  { %1266 = vsyncadd [#allocation12], 4294967280  ;;  %v1279_v0 = vmov 0   ;;  %v1016_v1 = vld [vmem:[#allocation5 + $0x4] ss:$8 sps:$4 sm:$0xff]   ;;  %vm208_vm0 = vcmask 1041408   ;;  %v139_v57 = vlaneseq }
  0x6f   :  { %247 = vmatprep.mubr.bf16.mxu0 %v1279_v0  ;;  %v1018_v2 = vld [vmem:[#allocation5] ss:$8 sps:$4 sm:$0xff]   ;;  %215 = vmatprep.subr.bf16.mxu0 %v1016_v1  ;;  %v1019_v3 = vld [vmem:[#allocation5 + $0x14] ss:$8 sps:$4 sm:$0xff]   ;;  %v1021_v4 = vld [vmem:[#allocation5 + $0x10] ss:$8 sps:$4 sm:$0xff]  }
  0x70   :  { %216 = vmatpush1.bf16.msra.mxu0 %v1018_v2  ;;  %v1022_v5 = vld [vmem:[#allocation5 + $0x24] ss:$8 sps:$4 sm:$0xff]   ;;  %v1024_v6 = vld [vmem:[#allocation5 + $0x20] ss:$8 sps:$4 sm:$0xff]   ;;  %v1025_v7 = vld [vmem:[#allocation5 + $0x34] ss:$8 sps:$4 sm:$0xff]  }
  0x71   :  { %217 = vmatprep.subr.bf16.mxu0 %v1019_v3  ;;  %v1033_v8 = vld [vmem:[#allocation7 + $0x4] ss:$8 sps:$4 sm:$0xff]   ;;  %v1035_v9 = vld [vmem:[#allocation7] ss:$8 sps:$4 sm:$0xff]   ;;  %v1036_v10 = vld [vmem:[#allocation7 + $0x14] ss:$8 sps:$4 sm:$0xff]  }
  0x72   :  { %v1027_v11 = vld [vmem:[#allocation5 + $0x30] ss:$8 sps:$4 sm:$0xff]   ;;  %492 = vmatprep.subr.bf16.mxu1 %v1033_v8  ;;  %v1028_v13 = vld [vmem:[#allocation5 + $0x44] ss:$8 sps:$4 sm:$0xff]   ;;  %v1030_v16 = vld [vmem:[#allocation5 + $0x40] ss:$8 sps:$4 sm:$0xff]  }
  0x73   :  { %493 = vmatpush1.bf16.msra.mxu1 %v1035_v9  ;;  %v1038_v12 = vld [vmem:[#allocation7 + $0x10] ss:$8 sps:$4 sm:$0xff]   ;;  %v1039_v14 = vld [vmem:[#allocation7 + $0x24] ss:$8 sps:$4 sm:$0xff]   ;;  %v1041_v17 = vld [vmem:[#allocation7 + $0x20] ss:$8 sps:$4 sm:$0xff]  }
  0x74   :  { %218 = vmatpush1.bf16.msra.mxu0 %v1021_v4  ;;  %494 = vmatprep.subr.bf16.mxu1 %v1036_v10  ;;  %v136_v15 = vld [vmem:[#allocation5 + $0x50] sm:$0x33]  ;;  %v124_v21 = vld [vmem:[#allocation2] sm:$0xff]  ;;  %vm204_vm1 = vcmask 687104   ;;  %v1083_v51 = vld [vmem:[#allocation8 + $0x48] sm:$0xff]   ;;  %v140_v58 = vshrl.u32 %v139_v57, 7 }
  0x75   :  { %219 = vmatprep.subr.bf16.mxu0 %v1022_v5  ;;  %v890_v18 = vcombine.high %v136_v15, %v136_v15  ;;  %v889_v19 = vcombine.low %v136_v15, %v136_v15  ;;  %v1042_v20 = vld [vmem:[#allocation7 + $0x34] ss:$8 sps:$4 sm:$0xff]   ;;  %v1044_v22 = vld [vmem:[#allocation7 + $0x30] ss:$8 sps:$4 sm:$0xff]   ;;  %v1045_v24 = vld [vmem:[#allocation7 + $0x44] ss:$8 sps:$4 sm:$0xff]   ;;  %v125_v25 = vpack.c.bf16 %v124_v21, %v124_v21 }
  0x76   :  { %v1047_v26 = vld [vmem:[#allocation7 + $0x40] ss:$8 sps:$4 sm:$0xff]   ;;  %v1048_v27 = vld [vmem:[#allocation7 + $0x54] ss:$8 sps:$4 sm:$0xff]   ;;  %v1050_v28 = vld [vmem:[#allocation7 + $0x50] ss:$8 sps:$4 sm:$0xff]  }
  0x77   :  { %495 = vmatpush1.bf16.msra.mxu1 %v1038_v12  ;;  %v210_v23 = vsel %vm208_vm0, %v889_v19, 0  ;;  %v1051_v29 = vld [vmem:[#allocation7 + $0x64] ss:$8 sps:$4 sm:$0xff]   ;;  %v1053_v30 = vld [vmem:[#allocation7 + $0x60] ss:$8 sps:$4 sm:$0xff]   ;;  %v1085_v53 = vld [vmem:[#allocation8 + $0x50] sm:$0xff]  }
  0x78   :  { %220 = vmatpush1.bf16.msra.mxu0 %v1024_v6  ;;  %496 = vmatprep.subr.bf16.mxu1 %v1039_v14  ;;  %v1054_v31 = vld [vmem:[#allocation7 + $0x74] ss:$8 sps:$4 sm:$0xff]   ;;  %v1056_v32 = vld [vmem:[#allocation7 + $0x70] ss:$8 sps:$4 sm:$0xff]   ;;  %v1057_v33 = vld [vmem:[#allocation7 + $0x84] ss:$8 sps:$4 sm:$0xff]  }
  0x79   :  { %221 = vmatprep.subr.bf16.mxu0 %v1025_v7  ;;  %v1059_v34 = vld [vmem:[#allocation7 + $0x80] ss:$8 sps:$4 sm:$0xff]   ;;  %v1060_v35 = vld [vmem:[#allocation7 + $0x94] ss:$8 sps:$4 sm:$0xff]   ;;  %v1062_v36 = vld [vmem:[#allocation7 + $0x90] ss:$8 sps:$4 sm:$0xff]  }
  0x7a   :  { %v1063_v37 = vld [vmem:[#allocation7 + $0xa4] ss:$8 sps:$4 sm:$0xff]   ;;  %v1065_v38 = vld [vmem:[#allocation7 + $0xa0] ss:$8 sps:$4 sm:$0xff]   ;;  %v1066_v39 = vld [vmem:[#allocation7 + $0xb4] ss:$8 sps:$4 sm:$0xff]  }
  0x7b   :  { %497 = vmatpush1.bf16.msra.mxu1 %v1041_v17  ;;  %v1068_v40 = vld [vmem:[#allocation7 + $0xb0] ss:$8 sps:$4 sm:$0xff]   ;;  %v1069_v41 = vld [vmem:[#allocation7 + $0xc4] ss:$8 sps:$4 sm:$0xff]   ;;  %v1071_v42 = vld [vmem:[#allocation7 + $0xc0] ss:$8 sps:$4 sm:$0xff]  }
  0x7c   :  { %222 = vmatpush1.bf16.msra.mxu0 %v1027_v11  ;;  %498 = vmatprep.subr.bf16.mxu1 %v1042_v20  ;;  %v1072_v43 = vld [vmem:[#allocation7 + $0xd4] ss:$8 sps:$4 sm:$0xff]   ;;  %v1074_v44 = vld [vmem:[#allocation7 + $0xd0] ss:$8 sps:$4 sm:$0xff]   ;;  %v1075_v45 = vld [vmem:[#allocation7 + $0xe4] ss:$8 sps:$4 sm:$0xff]  }
  0x7d   :  { %223 = vmatprep.subr.bf16.mxu0 %v1028_v13  ;;  %v1077_v46 = vld [vmem:[#allocation7 + $0xe0] ss:$8 sps:$4 sm:$0xff]   ;;  %v1078_v47 = vld [vmem:[#allocation7 + $0xf4] ss:$8 sps:$4 sm:$0xff]   ;;  %v1080_v48 = vld [vmem:[#allocation7 + $0xf0] ss:$8 sps:$4 sm:$0xff]  }
  0x7e   :  { %v1081_v49 = vld [vmem:[#allocation8 + $0x40] sm:$0xff]   ;;  %v1084_v52 = vld [vmem:[#allocation8 + $0x8] sm:$0xff]   ;;  %v1086_v54 = vld [vmem:[#allocation8 + $0x10] sm:$0xff]   ;;  %v1444_v59 = vsub.s32 0, %v140_v58  ;;  %v1449_v61 = vsub.s32 1, %v140_v58  ;;  %vm1281_vm2 = vmmov 0  }
  0x7f   :  { %499 = vmatpush1.bf16.msra.mxu1 %v1044_v22  ;;  %v1082_v50 = vld [vmem:[#allocation8] sm:$0xff]   ;;  %v1087_v55 = vld [vmem:[#allocation8 + $0x58] sm:$0xff]   ;;  %v1091_v22 = vld [vmem:[#allocation8 + $0x68] sm:$0xff]  }
  0x80   :  { %224 = vmatpush1.bf16.msra.mxu0 %v1030_v16  ;;  %500 = vmatprep.subr.bf16.mxu1 %v1045_v24  ;;  %v1088_v56 = vld [vmem:[#allocation8 + $0x18] sm:$0xff]   ;;  %v137_v60 = vld [vmem:[%s1495_s2] sm:$0x3]  ;;  %v1093_v24 = vld [vmem:[#allocation8 + $0x70] sm:$0xff]  }
  0x81   :  { %891 = vmatprep.subr.msk.bf16.mxu0 %vm208_vm0, %v890_v18  ;;  %v142_v62 = vrot.slane %v137_v60, %v1444_v59  ;;  %v258_v63 = vld [vmem:[%s1496_s3] sm:$0x3]  ;;  %v146_v0 = vrot.slane %v137_v60, %v1449_v61  ;;  %v1099_v60 = vld [vmem:[#allocation10 + $0x10] sm:$0xff]  }
  0x82   :  { %v272_v2 = vld [vmem:[%s1497_s4] sm:$0x3]  ;;  %v263_v4 = vrot.slane %v258_v63, %v1444_v59  ;;  %v267_v7 = vrot.slane %v258_v63, %v1449_v61  ;;  %v1102_v63 = vld [vmem:[#allocation10 + $0x28] sm:$0xff]  }
  0x83   :  { %501 = vmatpush1.bf16.msra.mxu1 %v1047_v26  ;;  %v277_v11 = vrot.slane %v272_v2, %v1444_v59  ;;  %v281_v13 = vrot.slane %v272_v2, %v1449_v61  ;;  %v1089_v20 = vld [vmem:[#allocation8 + $0x60] sm:$0xff]   ;;  %v1095_v26 = vld [vmem:[#allocation8 + $0x78] sm:$0xff]  }
  0x84   :  { %226 = vmatpush1.bf16.msra.mxu0 %v210_v23  ;;  %502 = vmatprep.subr.bf16.mxu1 %v1048_v27  ;;  %v1090_v21 = vld [vmem:[#allocation8 + $0x20] sm:$0xff]   ;;  %v1092_v23 = vld [vmem:[#allocation8 + $0x28] sm:$0xff]   ;;  %v1096_v27 = vld [vmem:[#allocation8 + $0x38] sm:$0xff]  }
  0x85   :  { %951 = vmatprep.subr.bf16.mxu0 %v1081_v49  ;;  %v1097_v57 = vld [vmem:[#allocation10] sm:$0xff]  }
  0x87   :  { %892 = vmatmul.mubr.msk.bf16.vlgmr.msra.gmra.mrb[0].mxu0 %vm204_vm1, %v125_v25  ;;  %503 = vmatpush1.bf16.msra.mxu1 %v1050_v28  ;;  %v1094_v25 = vld [vmem:[#allocation8 + $0x30] sm:$0xff]   ;;  %v1280_v28 = vmov 0.0  }
  0x88   :  { %504 = vmatprep.subr.bf16.mxu1 %v1051_v29  ;;  %952 = vmatpush3.bf16.msra.mxu0 %v1082_v50  ;;  %v320_v29 = vld [vmem:[%s1499_s6] sm:$0x3] }
  0x89   :  { %953 = vmatprep.subr.bf16.mxu0 %v1083_v51 }
  0x8b   :  { %505 = vmatpush1.bf16.msra.mxu1 %v1053_v30  ;;  %v325_v30 = vrot.slane %v320_v29, %v1444_v59 }
  0x8c   :  { %506 = vmatprep.subr.bf16.mxu1 %v1054_v31  ;;  %954 = vmatpush3.bf16.msra.mxu0 %v1084_v52  ;;  %v535_v31 = vld [vmem:[%s1500_s7] sm:$0x3] }
  0x8d   :  { %955 = vmatprep.subr.bf16.mxu0 %v1085_v53 }
  0x8f   :  { %507 = vmatpush1.bf16.msra.mxu1 %v1056_v32  ;;  %v329_v32 = vrot.slane %v320_v29, %v1449_v61 }
  0x90   :  { %508 = vmatprep.subr.bf16.mxu1 %v1057_v33  ;;  %956 = vmatpush3.bf16.msra.mxu0 %v1086_v54 }
  0x91   :  { %957 = vmatprep.subr.bf16.mxu0 %v1087_v55 }
  0x93   :  { %509 = vmatpush1.bf16.msra.mxu1 %v1059_v34  ;;  %v549_v34 = vld [vmem:[%s1501_s8] sm:$0x3]  ;;  %s1282_s8 = smov [#allocation13]  }
  0x94   :  { %510 = vmatprep.subr.bf16.mxu1 %v1060_v35  ;;  %958 = vmatpush3.bf16.msra.mxu0 %v1088_v56  ;;  %s867_s5 = sshll.u32 %s1282_s8, 4  ;;  %s868_s5 = int_to_ptr.vmem [resolvable:$true] %s867_s5 }
  0x95   :  { %959 = vmatprep.subr.bf16.mxu0 %v1089_v20  ;;  %p1242_p7 = scmp.lt.s32.totalorder %s868_s5, %s868_s5 }
  0x97   :  { %511 = vmatpush1.bf16.msra.mxu1 %v1062_v36  ;;  %v540_v36 = vrot.slane %v535_v31, %v1444_v59 }
  0x98   :  { %512 = vmatprep.subr.bf16.mxu1 %v1063_v37  ;;  %960 = vmatpush3.bf16.msra.mxu0 %v1090_v21 }
  0x99   :  { %961 = vmatprep.subr.bf16.mxu0 %v1091_v22 }
  0x9b   :  { %513 = vmatpush1.bf16.msra.mxu1 %v1065_v38 }
  0x9c   :  { %514 = vmatprep.subr.bf16.mxu1 %v1066_v39  ;;  %962 = vmatpush3.bf16.msra.mxu0 %v1092_v23  ;;  %v544_v39 = vrot.slane %v535_v31, %v1449_v61 }
  0x9d   :  { %963 = vmatprep.subr.bf16.mxu0 %v1093_v24 }
  0x9f   :  { %515 = vmatpush1.bf16.msra.mxu1 %v1068_v40 }
  0xa0   :  { %516 = vmatprep.subr.bf16.mxu1 %v1069_v41  ;;  %964 = vmatpush3.bf16.msra.mxu0 %v1094_v25 }
  0xa1   :  { %965 = vmatprep.subr.bf16.mxu0 %v1095_v26 }
  0xa3   :  { %517 = vmatpush1.bf16.msra.mxu1 %v1071_v42  ;;  %v554_v42 = vrot.slane %v549_v34, %v1444_v59  ;;  %v1098_v59 = vld [vmem:[#allocation10 + $0x8] sm:$0xff]  }
  0xa4   :  { %518 = vmatprep.subr.bf16.mxu1 %v1072_v43  ;;  %966 = vmatpush3.bf16.msra.mxu0 %v1096_v27 }
  0xa5   :  { %982 = vmatprep.subr.bf16.mxu0 %v1280_v28 }
  0xa7   :  { %519 = vmatpush1.bf16.msra.mxu1 %v1074_v44 }
  0xa8   :  { %520 = vmatprep.subr.bf16.mxu1 %v1075_v45  ;;  %v558_v45 = vrot.slane %v549_v34, %v1449_v61  ;;  %v1100_v61 = vld [vmem:[#allocation10 + $0x18] sm:$0xff]  }
  0xab   :  { %521 = vmatpush1.bf16.msra.mxu1 %v1077_v46 }
  0xac   :  { %522 = vmatprep.subr.bf16.mxu1 %v1078_v47 }
  0xaf   :  { %523 = vmatpush1.bf16.msra.mxu1 %v1080_v48 }
 0x15a   :  { %v249_v1 = vpop.f32.mrb[0].mxu0 }
 0x15b   :  { %v250_v3 = vadd.f32 %v249_v1, %v142_v62  ;;  %v251_v5 = vpop.f32.mrb[1].mxu0  ;;  %v1101_v62 = vld [vmem:[#allocation10 + $0x20] sm:$0xff]   ;;  %v1104_v1 = vld [vmem:[#allocation10 + $0x38] sm:$0xff]  }
 0x15c   :  { %v252_v6 = vadd.f32 %v251_v5, %v146_v0  ;;  %v253_v8 = vpop.f32.mrb[2].mxu0  ;;  %v1103_v0 = vld [vmem:[#allocation10 + $0x30] sm:$0xff]  }
 0x15d   :  { %v256_v9 = vmax.f32 %v250_v3, 0.0  ;;  %v254_v10 = vpop.f32.mrb[3].mxu0  ;;  %v925_v3 = vld [vmem:[%s1503_s10] ss:$0 sm:$0xff]  ;;  %s1237_s10 = scalar_lea.vmem %s868_s5, 64 }
 0x15e   :  { %v257_v12 = vmax.f32 %v252_v6, 0.0  ;;  %p1238_p6 = scmp.ne.s32.totalorder %s868_s5, %s1237_s10  ;;  %p1243_p8 = scmp.lt.s32.totalorder %s1237_s10, %s1237_s10 }
 0x15f   :  { %v270_v14 = vmul.f32 %v263_v4, %v256_v9 }
 0x160   :  { %v271_v15 = vmul.f32 %v267_v7, %v257_v12  ;;  %p1244_p9 = por %p1243_p8, %p1242_p7 }
 0x161   :  { %v284_v16 = vadd.f32 %v277_v11, %v270_v14  ;;  %v942_v11 = vld [vmem:[#allocation11] ss:$0 sm:$0xff] }
 0x162   :  { %v285_v17 = vadd.f32 %v281_v13, %v271_v15  ;;  %p1245_p10 = pnand %p1244_p9, %p1238_p6 }
 0x163   :  { %v286_v19 = vpack.c.bf16 %v284_v16, %v284_v16 }
 0x164   :  { %v287_v18 = vpack.c.bf16 %v285_v17, %v285_v17 }
 0x165   :  { %v563_v48 = vunpack.c.l.bf16 %v286_v19 }
 0x166   :  { %524 = vmatprep.mubr.bf16.mxu1 %v287_v18  ;;  %v564_v50 = vunpack.c.l.bf16 %v287_v18 }
 0x167   :  { %525 = vmatmul.mubr.bf16.vlgmr.msra.gmra.mrb[0].mxu1 %v286_v19 }
 0x23a   :  { %v526_v33 = vpop.f32.mrb[0].mxu1 }
 0x23b   :  { %v527_v35 = vadd.f32 %v526_v33, %v325_v30  ;;  %v528_v37 = vpop.f32.mrb[1].mxu1 }
 0x23c   :  { %v529_v38 = vadd.f32 %v528_v37, %v329_v32  ;;  %v530_v40 = vpop.f32.mrb[2].mxu1 }
 0x23d   :  { %v533_v41 = vmax.f32 %v527_v35, 0.0  ;;  %v531_v43 = vpop.f32.mrb[3].mxu1 }
 0x23e   :  { %v534_v44 = vmax.f32 %v529_v38, 0.0 }
 0x23f   :  { %v547_v46 = vmul.f32 %v540_v36, %v533_v41 }
 0x240   :  { %v548_v47 = vmul.f32 %v544_v39, %v534_v44 }
 0x241   :  { %v561_v49 = vadd.f32 %v554_v42, %v547_v46 }
 0x242   :  { %v562_v51 = vadd.f32 %v558_v45, %v548_v47 }
 0x243   :  { %v565_v52 = vadd.f32 %v563_v48, %v561_v49 }
 0x244   :  { %v566_v53 = vadd.f32 %v564_v50, %v562_v51 }
 0x245   :  { %v567_v54 = vmax.f32 %v565_v52, 0.0 }
 0x246   :  { %v568_v55 = vmax.f32 %v566_v53, 0.0 }
 0x247   :  { %v569_v58 = vpack.c.bf16 %v567_v54, %v567_v54 }
 0x248   :  { %v570_v56 = vpack.c.bf16 %v568_v55, %v568_v55 }
 0x24a   :  { %738 = vmatprep.mubr.bf16.mxu0 %v570_v56 }
 0x24b   :  { %739 = vmatmul.mubr.bf16.vlgmr.msra.gmra.mrb[4].mxu0 %v569_v58 }
 0x24c   :  { %983 = vmatpush3.bf16.msra.mxu0 %v1097_v57  ;;  %998 = vmatprep.mubr.msk.bf16.mxu0 %vm1281_vm2, %v1280_v28 }
 0x24d   :  { %984 = vmatprep.subr.bf16.mxu0 %v1280_v28 }
 0x250   :  { %985 = vmatpush3.bf16.msra.mxu0 %v1098_v59 }
 0x251   :  { %986 = vmatprep.subr.bf16.mxu0 %v1280_v28 }
 0x254   :  { %987 = vmatpush3.bf16.msra.mxu0 %v1099_v60 }
 0x255   :  { %988 = vmatprep.subr.bf16.mxu0 %v1280_v28 }
 0x258   :  { %989 = vmatpush3.bf16.msra.mxu0 %v1100_v61 }
 0x259   :  { %990 = vmatprep.subr.bf16.mxu0 %v1280_v28 }
 0x25c   :  { %991 = vmatpush3.bf16.msra.mxu0 %v1101_v62 }
 0x25d   :  { %992 = vmatprep.subr.bf16.mxu0 %v1280_v28 }
 0x260   :  { %993 = vmatpush3.bf16.msra.mxu0 %v1102_v63 }
 0x261   :  { %994 = vmatprep.subr.bf16.mxu0 %v1280_v28 }
 0x264   :  { %995 = vmatpush3.bf16.msra.mxu0 %v1103_v0 }
 0x265   :  { %996 = vmatprep.subr.bf16.mxu0 %v1280_v28 }
 0x268   :  { %997 = vmatpush3.bf16.msra.mxu0 %v1104_v1 }
 0x31e   :  { %v967_v2 = vpop.f32.mrb[4].mxu0 }
 0x31f   :  { %v968_v4 = vpop.f32.mrb[5].mxu0 }
 0x320   :  { %v969_v5 = vadd.f32 %v968_v4, %v967_v2  ;;  %v970_v6 = vpop.f32.mrb[6].mxu0 }
 0x321   :  { %v971_v7 = vpop.f32.mrb[7].mxu0 }
 0x322   :  { %v741_v8 = vadd.f32 %v969_v5, %v925_v3 }
 0x324   :  { %v746_v9 = vmax.f32 %v741_v8, 0.0 }
 0x326   :  { %v747_v10 = vpack.c.bf16 %v746_v9, %v746_v9 }
 0x328   :  { %999 = vmatmul.mubr.bf16.vlgmr.msra.gmra.mrb[8].mxu0 %v747_v10 }
 0x3fb   :  { %v853_v12 = vpop.f32.mrb[8].mxu0 }
 0x3fc   :  { %v854_v13 = vadd.f32 %v942_v11, %v853_v12  ;;  %v1000_v14 = vpop.f32.mrb[9].mxu0 }
 0x3fd   :  { %v856_v15 = vpop.f32.mrb[10].mxu0 }
 0x3fe   :  { %v859_v16 = vpack.c.bf16 %v854_v13, %v854_v13  ;;  %v1001_v17 = vpop.f32.mrb[11].mxu0 }
 0x400   :  { %860 = vst [vmem:[#allocation13] sm:$0xf] %v859_v16 }
 0x401   :  { %1248 = shalt.err (!%p1245_p10)
}
 0x402   :  { %s1249_s24 = scalar_lea.hbm %s1506_s13, 64 }
 0x403   :  { %p1250_p11 = scmp.ne.s32.totalorder %s1506_s13, %s1249_s24  ;;  %p1253_p12 = scmp.lt.u32.totalorder %s1249_s24, %s1506_s13 }
 0x405   :  { %p1255_p13 = pnand %p1253_p12, %p1250_p11 }
 0x407   :  { %1258 = shalt.err (!%p1255_p13)
}
 0x408   :  { %870 = dma.vmem_to_hbm [thread:$0]  %s868_s5, 64, %s1506_s13, [#allocation4]  }
 0x409   :  { %1267 = dma.done.wait [#allocation4], 64  }
 0x40a   :  { %1268 = vsyncadd [#allocation4], 4294967232 }
 0x40b   :  { %874 = vsyncpa [#allocation3], 1 }
 0x40c   :  { %875 = vsyncpa [#allocation6], 1 }
 0x40d   :  { %876 = vsyncpa [#allocation9], 1 }
 0x40e   :  { %877 = vsyncpa [#allocation12], 1 }
 0x40f   :  { %878 = vsyncpa [#allocation4], 1 }

// kernel: _mlp_encoder_call.1
= control target key start
LH: loop header
LB: loop body
LE: loop exit
PB: predicated region body
PF: predicated region fallthrough
CT: control target
= control target key end

     0   :  { %18 = vsyncpa [#allocation3], 0  ;;  %s1493_s0 = inlined_call_operand.hbm [shape: f32[8,84], index: 0, kind: input, shape index: {}]   ;;  %s1494_s1 = inlined_call_operand.hbm [shape: bf16[84,256], index: 1, kind: input, shape index: {}]   ;;  %s1495_s2 = inlined_call_operand.vmem [shape: f32[1,256], index: 2, kind: input, shape index: {}]   ;;  %s1496_s3 = inlined_call_operand.vmem [shape: f32[1,256], index: 3, kind: input, shape index: {}]   ;;  %s1497_s4 = inlined_call_operand.vmem [shape: f32[1,256], index: 4, kind: input, shape index: {}]   ;;  %s1498_s5 = inlined_call_operand.hbm [shape: bf16[256,256], index: 5, kind: input, shape index: {}]   ;;  %s1499_s6 = inlined_call_operand.vmem [shape: f32[1,256], index: 6, kind: input, shape index: {}]   ;;  %s1500_s7 = inlined_call_operand.vmem [shape: f32[1,256], index: 7, kind: input, shape index: {}]   ;;  %s1501_s8 = inlined_call_operand.vmem [shape: f32[1,256], index: 8, kind: input, shape index: {}]   ;;  %s1502_s9 = inlined_call_operand.hbm [shape: bf16[256,128], index: 9, kind: input, shape index: {}]   ;;  %s1503_s10 = inlined_call_operand.vmem [shape: f32[1,128], index: 10, kind: input, shape index: {}]   ;;  %s1504_s11 = inlined_call_operand.hbm [shape: bf16[128,128], index: 11, kind: input, shape index: {}]   ;;  %s1505_s12 = inlined_call_operand.hbm [shape: f32[1,128], index: 12, kind: input, shape index: {}]   ;;  %s1506_s13 = inlined_call_operand.hbm [shape: bf16[8,128], index: 13, kind: output, shape index: {}]  }
   0x1   :  { %19 = vsyncpa [#allocation6], 0 }
   0x2   :  { %20 = vsyncpa [#allocation9], 0 }
   0x3   :  { %21 = vsyncpa [#allocation12], 0 }
   0x4   :  { %22 = vsyncpa [#allocation4], 0  ;;  %s1269_s25 = smov [#allocation5]   ;;  %s1105_s29 = scalar_lea.hbm %s1494_s1, 1408 }
   0x5   :  { %s38_s26 = sshll.u32 %s1269_s25, 4  ;;  %p1106_p0 = scmp.ne.s32.totalorder %s1494_s1, %s1105_s29  ;;  %s39_s26 = int_to_ptr.vmem [resolvable:$true] %s38_s26 }
   0x6   :  { %p1109_p1 = scmp.lt.u32.totalorder %s1105_s29, %s1494_s1 }
   0x8   :  { %p1111_p2 = pnand %p1109_p1, %p1106_p0 }
   0xa   :  { %1114 = shalt.err (!%p1111_p2)
}
   0xb   :  { %s1115_s17 = scalar_lea.vmem %s39_s26, 1408  ;;  %p1120_p4 = scmp.lt.s32.totalorder %s39_s26, %s39_s26 }
   0xc   :  { %p1116_p3 = scmp.ne.s32.totalorder %s39_s26, %s1115_s17  ;;  %p1121_p5 = scmp.lt.s32.totalorder %s1115_s17, %s1115_s17 }
   0xe   :  { %p1122_p6 = por %p1121_p5, %p1120_p4 }
  0x10   :  { %p1123_p7 = pnand %p1122_p6, %p1116_p3 }
  0x12   :  { %1126 = shalt.err (!%p1123_p7)
}
  0x13   :  { %s1270_s18 = smov 128   ;;  %s1271_s19 = smov 8  }
  0x14   :  { %44 = dma.hbm_to_vmem [thread:$0]  %s1494_s1, 1408, %s39_s26, [#allocation6], %s1270_s18, %s1270_s18, %s1271_s19  }
  0x15   :  { %s1272_s22 = smov [#allocation8]   ;;  %s1127_s27 = scalar_lea.hbm %s1502_s9, 2048 }
  0x16   :  { %s74_s23 = sshll.u32 %s1272_s22, 4  ;;  %p1128_p8 = scmp.ne.s32.totalorder %s1502_s9, %s1127_s27  ;;  %s75_s23 = int_to_ptr.vmem [resolvable:$true] %s74_s23 }
  0x17   :  { %p1131_p9 = scmp.lt.u32.totalorder %s1127_s27, %s1502_s9 }
  0x19   :  { %p1133_p10 = pnand %p1131_p9, %p1128_p8 }
  0x1b   :  { %1136 = shalt.err (!%p1133_p10)
}
  0x1c   :  { %s1137_s15 = scalar_lea.vmem %s75_s23, 2048  ;;  %p1142_p12 = scmp.lt.s32.totalorder %s75_s23, %s75_s23 }
  0x1d   :  { %p1138_p11 = scmp.ne.s32.totalorder %s75_s23, %s1137_s15  ;;  %p1143_p13 = scmp.lt.s32.totalorder %s1137_s15, %s1137_s15 }
  0x1f   :  { %p1144_p0 = por %p1143_p13, %p1142_p12 }
  0x21   :  { %p1145_p1 = pnand %p1144_p0, %p1138_p11 }
  0x23   :  { %1148 = shalt.err (!%p1145_p1)
}
  0x24   :  { %s1273_s1 = smov 64   ;;  %s1274_s26 = smov 4  }
  0x25   :  { %80 = dma.hbm_to_vmem [thread:$0]  %s1502_s9, 2048, %s75_s23, [#allocation9], %s1273_s1, %s1273_s1, %s1274_s26  }
  0x26   :  { %s1275_s20 = smov [#allocation2]   ;;  %s1276_s22 = smov [#allocation7]  }
  0x27   :  { %s29_s21 = sshll.u32 %s1275_s20, 4  ;;  %s56_s24 = sshll.u32 %s1276_s22, 4  ;;  %s30_s21 = int_to_ptr.vmem [resolvable:$true] %s29_s21  ;;  %s1383_s24 = int_to_ptr.vmem [resolvable:$true] %s56_s24 }
  0x28   :  { %s1149_s28 = scalar_lea.hbm %s1493_s0, 128 }
  0x29   :  { %p1150_p2 = scmp.ne.s32.totalorder %s1493_s0, %s1149_s28  ;;  %p1153_p3 = scmp.lt.u32.totalorder %s1149_s28, %s1493_s0 }
  0x2b   :  { %p1155_p4 = pnand %p1153_p3, %p1150_p2 }
  0x2d   :  { %1158 = shalt.err (!%p1155_p4)
}
  0x2e   :  { %s1159_s9 = scalar_lea.vmem %s30_s21, 128  ;;  %p1164_p6 = scmp.lt.s32.totalorder %s30_s21, %s30_s21 }
  0x2f   :  { %p1160_p5 = scmp.ne.s32.totalorder %s30_s21, %s1159_s9  ;;  %p1165_p7 = scmp.lt.s32.totalorder %s1159_s9, %s1159_s9 }
  0x31   :  { %p1166_p8 = por %p1165_p7, %p1164_p6 }
  0x33   :  { %p1167_p9 = pnand %p1166_p8, %p1160_p5 }
  0x35   :  { %1170 = shalt.err (!%p1167_p9)
}
  0x36   :  { %32 = dma.hbm_to_vmem [thread:$0]  %s1493_s0, 128, %s30_s21, [#allocation3]  }
  0x37   :  { %s1171_s22 = scalar_lea.hbm %s1498_s5, 4096 }
  0x38   :  { %p1172_p10 = scmp.ne.s32.totalorder %s1498_s5, %s1171_s22  ;;  %p1175_p11 = scmp.lt.u32.totalorder %s1171_s22, %s1498_s5 }
  0x3a   :  { %p1177_p12 = pnand %p1175_p11, %p1172_p10 }
  0x3c   :  { %1180 = shalt.err (!%p1177_p12)
}
  0x3d   :  { %s1181_s30 = scalar_lea.vmem %s1383_s24, 4096  ;;  %p1186_p0 = scmp.lt.s32.totalorder %s1383_s24, %s1383_s24 }
  0x3e   :  { %p1182_p13 = scmp.ne.s32.totalorder %s1383_s24, %s1181_s30  ;;  %p1187_p1 = scmp.lt.s32.totalorder %s1181_s30, %s1181_s30 }
  0x40   :  { %p1188_p2 = por %p1187_p1, %p1186_p0 }
  0x42   :  { %p1189_p3 = pnand %p1188_p2, %p1182_p13 }
  0x44   :  { %1192 = shalt.err (!%p1189_p3)
}
  0x45   :  { %62 = dma.hbm_to_vmem [thread:$0]  %s1498_s5, 4096, %s1383_s24, [#allocation6], %s1270_s18, %s1270_s18, %s1271_s19  }
  0x46   :  { %s1277_s14 = smov [#allocation10]   ;;  %s1278_s9 = smov [#allocation11]  }
  0x47   :  { %s88_s15 = sshll.u32 %s1277_s14, 4  ;;  %s101_s23 = sshll.u32 %s1278_s9, 4  ;;  %s89_s15 = int_to_ptr.vmem [resolvable:$true] %s88_s15  ;;  %s102_s23 = int_to_ptr.vmem [resolvable:$true] %s101_s23 }
  0x48   :  { %s1193_s20 = scalar_lea.hbm %s1504_s11, 1024 }
  0x49   :  { %p1194_p4 = scmp.ne.s32.totalorder %s1504_s11, %s1193_s20  ;;  %p1197_p5 = scmp.lt.u32.totalorder %s1193_s20, %s1504_s11 }
  0x4b   :  { %p1199_p6 = pnand %p1197_p5, %p1194_p4 }
  0x4d   :  { %1202 = shalt.err (!%p1199_p6)
}
  0x4e   :  { %s1203_s5 = scalar_lea.vmem %s89_s15, 1024  ;;  %p1208_p8 = scmp.lt.s32.totalorder %s89_s15, %s89_s15 }
  0x4f   :  { %p1204_p7 = scmp.ne.s32.totalorder %s89_s15, %s1203_s5  ;;  %p1209_p9 = scmp.lt.s32.totalorder %s1203_s5, %s1203_s5 }
  0x51   :  { %p1210_p10 = por %p1209_p9, %p1208_p8 }
  0x53   :  { %p1211_p11 = pnand %p1210_p10, %p1204_p7 }
  0x55   :  { %1214 = shalt.err (!%p1211_p11)
}
  0x56   :  { %94 = dma.hbm_to_vmem [thread:$0]  %s1504_s11, 1024, %s89_s15, [#allocation9], %s1273_s1, %s1273_s1, %s1274_s26  }
  0x57   :  { %s1215_s30 = scalar_lea.hbm %s1505_s12, 16 }
  0x58   :  { %p1216_p12 = scmp.ne.s32.totalorder %s1505_s12, %s1215_s30  ;;  %p1219_p13 = scmp.lt.u32.totalorder %s1215_s30, %s1505_s12 }
  0x5a   :  { %p1221_p0 = pnand %p1219_p13, %p1216_p12 }
  0x5c   :  { %1224 = shalt.err (!%p1221_p0)
}
  0x5d   :  { %s1225_s16 = scalar_lea.vmem %s102_s23, 16  ;;  %s1229_s17 = scalar_lea.vmem %s102_s23, 32 }
  0x5e   :  { %p1226_p1 = scmp.ne.s32.totalorder %s102_s23, %s1225_s16  ;;  %p1230_p2 = scmp.lt.s32.totalorder %s102_s23, %s102_s23 }
  0x5f   :  { %p1231_p3 = scmp.lt.s32.totalorder %s1229_s17, %s1225_s16 }
  0x61   :  { %p1232_p4 = por %p1231_p3, %p1230_p2 }
  0x63   :  { %p1233_p5 = pnand %p1232_p4, %p1226_p1 }
  0x65   :  { %1236 = shalt.err (!%p1233_p5)
}
  0x66   :  { %104 = dma.hbm_to_vmem [thread:$0]  %s1505_s12, 16, %s102_s23, [#allocation12]  }
  0x67   :  { %1259 = dma.done.wait [#allocation3], 128  }
  0x68   :  { %1260 = vsyncadd [#allocation3], 4294967168 }
  0x69   :  { %1261 = dma.done.wait [#allocation6], 5504  }
  0x6a   :  { %1262 = vsyncadd [#allocation6], 4294961792 }
  0x6b   :  { %1263 = dma.done.wait [#allocation9], 3072  }
  0x6c   :  { %1264 = vsyncadd [#allocation9], 4294964224 }
  0x6d   :  { %1265 = dma.done.wait [#allocation12], 16  }
  0x6e   :  { %1266 = vsyncadd [#allocation12], 4294967280  ;;  %v1279_v0 = vmov 0   ;;  %v1016_v1 = vld [vmem:[#allocation5 + $0x4] ss:$8 sps:$4 sm:$0xff]   ;;  %vm208_vm0 = vcmask 1041408   ;;  %v139_v57 = vlaneseq }
  0x6f   :  { %247 = vmatprep.mubr.bf16.mxu0 %v1279_v0  ;;  %v1018_v2 = vld [vmem:[#allocation5] ss:$8 sps:$4 sm:$0xff]   ;;  %215 = vmatprep.subr.bf16.mxu0 %v1016_v1  ;;  %v1019_v3 = vld [vmem:[#allocation5 + $0x14] ss:$8 sps:$4 sm:$0xff]   ;;  %v1021_v4 = vld [vmem:[#allocation5 + $0x10] ss:$8 sps:$4 sm:$0xff]  }
  0x70   :  { %216 = vmatpush1.bf16.msra.mxu0 %v1018_v2  ;;  %v1022_v5 = vld [vmem:[#allocation5 + $0x24] ss:$8 sps:$4 sm:$0xff]   ;;  %v1024_v6 = vld [vmem:[#allocation5 + $0x20] ss:$8 sps:$4 sm:$0xff]   ;;  %v1025_v7 = vld [vmem:[#allocation5 + $0x34] ss:$8 sps:$4 sm:$0xff]  }
  0x71   :  { %217 = vmatprep.subr.bf16.mxu0 %v1019_v3  ;;  %v1033_v8 = vld [vmem:[#allocation7 + $0x4] ss:$8 sps:$4 sm:$0xff]   ;;  %v1035_v9 = vld [vmem:[#allocation7] ss:$8 sps:$4 sm:$0xff]   ;;  %v1036_v10 = vld [vmem:[#allocation7 + $0x14] ss:$8 sps:$4 sm:$0xff]  }
  0x72   :  { %v1027_v11 = vld [vmem:[#allocation5 + $0x30] ss:$8 sps:$4 sm:$0xff]   ;;  %492 = vmatprep.subr.bf16.mxu1 %v1033_v8  ;;  %v1028_v13 = vld [vmem:[#allocation5 + $0x44] ss:$8 sps:$4 sm:$0xff]   ;;  %v1030_v16 = vld [vmem:[#allocation5 + $0x40] ss:$8 sps:$4 sm:$0xff]  }
  0x73   :  { %493 = vmatpush1.bf16.msra.mxu1 %v1035_v9  ;;  %v1038_v12 = vld [vmem:[#allocation7 + $0x10] ss:$8 sps:$4 sm:$0xff]   ;;  %v1039_v14 = vld [vmem:[#allocation7 + $0x24] ss:$8 sps:$4 sm:$0xff]   ;;  %v1041_v17 = vld [vmem:[#allocation7 + $0x20] ss:$8 sps:$4 sm:$0xff]  }
  0x74   :  { %218 = vmatpush1.bf16.msra.mxu0 %v1021_v4  ;;  %494 = vmatprep.subr.bf16.mxu1 %v1036_v10  ;;  %v136_v15 = vld [vmem:[#allocation5 + $0x50] sm:$0x33]  ;;  %v124_v21 = vld [vmem:[#allocation2] sm:$0xff]  ;;  %vm204_vm1 = vcmask 687104   ;;  %v1083_v51 = vld [vmem:[#allocation8 + $0x48] sm:$0xff]   ;;  %v140_v58 = vshrl.u32 %v139_v57, 7 }
  0x75   :  { %219 = vmatprep.subr.bf16.mxu0 %v1022_v5  ;;  %v890_v18 = vcombine.high %v136_v15, %v136_v15  ;;  %v889_v19 = vcombine.low %v136_v15, %v136_v15  ;;  %v1042_v20 = vld [vmem:[#allocation7 + $0x34] ss:$8 sps:$4 sm:$0xff]   ;;  %v1044_v22 = vld [vmem:[#allocation7 + $0x30] ss:$8 sps:$4 sm:$0xff]   ;;  %v1045_v24 = vld [vmem:[#allocation7 + $0x44] ss:$8 sps:$4 sm:$0xff]   ;;  %v125_v25 = vpack.c.bf16 %v124_v21, %v124_v21 }
  0x76   :  { %v1047_v26 = vld [vmem:[#allocation7 + $0x40] ss:$8 sps:$4 sm:$0xff]   ;;  %v1048_v27 = vld [vmem:[#allocation7 + $0x54] ss:$8 sps:$4 sm:$0xff]   ;;  %v1050_v28 = vld [vmem:[#allocation7 + $0x50] ss:$8 sps:$4 sm:$0xff]  }
  0x77   :  { %495 = vmatpush1.bf16.msra.mxu1 %v1038_v12  ;;  %v210_v23 = vsel %vm208_vm0, %v889_v19, 0  ;;  %v1051_v29 = vld [vmem:[#allocation7 + $0x64] ss:$8 sps:$4 sm:$0xff]   ;;  %v1053_v30 = vld [vmem:[#allocation7 + $0x60] ss:$8 sps:$4 sm:$0xff]   ;;  %v1085_v53 = vld [vmem:[#allocation8 + $0x50] sm:$0xff]  }
  0x78   :  { %220 = vmatpush1.bf16.msra.mxu0 %v1024_v6  ;;  %496 = vmatprep.subr.bf16.mxu1 %v1039_v14  ;;  %v1054_v31 = vld [vmem:[#allocation7 + $0x74] ss:$8 sps:$4 sm:$0xff]   ;;  %v1056_v32 = vld [vmem:[#allocation7 + $0x70] ss:$8 sps:$4 sm:$0xff]   ;;  %v1057_v33 = vld [vmem:[#allocation7 + $0x84] ss:$8 sps:$4 sm:$0xff]  }
  0x79   :  { %221 = vmatprep.subr.bf16.mxu0 %v1025_v7  ;;  %v1059_v34 = vld [vmem:[#allocation7 + $0x80] ss:$8 sps:$4 sm:$0xff]   ;;  %v1060_v35 = vld [vmem:[#allocation7 + $0x94] ss:$8 sps:$4 sm:$0xff]   ;;  %v1062_v36 = vld [vmem:[#allocation7 + $0x90] ss:$8 sps:$4 sm:$0xff]  }
  0x7a   :  { %v1063_v37 = vld [vmem:[#allocation7 + $0xa4] ss:$8 sps:$4 sm:$0xff]   ;;  %v1065_v38 = vld [vmem:[#allocation7 + $0xa0] ss:$8 sps:$4 sm:$0xff]   ;;  %v1066_v39 = vld [vmem:[#allocation7 + $0xb4] ss:$8 sps:$4 sm:$0xff]  }
  0x7b   :  { %497 = vmatpush1.bf16.msra.mxu1 %v1041_v17  ;;  %v1068_v40 = vld [vmem:[#allocation7 + $0xb0] ss:$8 sps:$4 sm:$0xff]   ;;  %v1069_v41 = vld [vmem:[#allocation7 + $0xc4] ss:$8 sps:$4 sm:$0xff]   ;;  %v1071_v42 = vld [vmem:[#allocation7 + $0xc0] ss:$8 sps:$4 sm:$0xff]  }
  0x7c   :  { %222 = vmatpush1.bf16.msra.mxu0 %v1027_v11  ;;  %498 = vmatprep.subr.bf16.mxu1 %v1042_v20  ;;  %v1072_v43 = vld [vmem:[#allocation7 + $0xd4] ss:$8 sps:$4 sm:$0xff]   ;;  %v1074_v44 = vld [vmem:[#allocation7 + $0xd0] ss:$8 sps:$4 sm:$0xff]   ;;  %v1075_v45 = vld [vmem:[#allocation7 + $0xe4] ss:$8 sps:$4 sm:$0xff]  }
  0x7d   :  { %223 = vmatprep.subr.bf16.mxu0 %v1028_v13  ;;  %v1077_v46 = vld [vmem:[#allocation7 + $0xe0] ss:$8 sps:$4 sm:$0xff]   ;;  %v1078_v47 = vld [vmem:[#allocation7 + $0xf4] ss:$8 sps:$4 sm:$0xff]   ;;  %v1080_v48 = vld [vmem:[#allocation7 + $0xf0] ss:$8 sps:$4 sm:$0xff]  }
  0x7e   :  { %v1081_v49 = vld [vmem:[#allocation8 + $0x40] sm:$0xff]   ;;  %v1084_v52 = vld [vmem:[#allocation8 + $0x8] sm:$0xff]   ;;  %v1086_v54 = vld [vmem:[#allocation8 + $0x10] sm:$0xff]   ;;  %v1444_v59 = vsub.s32 0, %v140_v58  ;;  %v1449_v61 = vsub.s32 1, %v140_v58  ;;  %vm1281_vm2 = vmmov 0  }
  0x7f   :  { %499 = vmatpush1.bf16.msra.mxu1 %v1044_v22  ;;  %v1082_v50 = vld [vmem:[#allocation8] sm:$0xff]   ;;  %v1087_v55 = vld [vmem:[#allocation8 + $0x58] sm:$0xff]   ;;  %v1091_v22 = vld [vmem:[#allocation8 + $0x68] sm:$0xff]  }
  0x80   :  { %224 = vmatpush1.bf16.msra.mxu0 %v1030_v16  ;;  %500 = vmatprep.subr.bf16.mxu1 %v1045_v24  ;;  %v1088_v56 = vld [vmem:[#allocation8 + $0x18] sm:$0xff]   ;;  %v137_v60 = vld [vmem:[%s1495_s2] sm:$0x3]  ;;  %v1093_v24 = vld [vmem:[#allocation8 + $0x70] sm:$0xff]  }
  0x81   :  { %891 = vmatprep.subr.msk.bf16.mxu0 %vm208_vm0, %v890_v18  ;;  %v142_v62 = vrot.slane %v137_v60, %v1444_v59  ;;  %v258_v63 = vld [vmem:[%s1496_s3] sm:$0x3]  ;;  %v146_v0 = vrot.slane %v137_v60, %v1449_v61  ;;  %v1099_v60 = vld [vmem:[#allocation10 + $0x10] sm:$0xff]  }
  0x82   :  { %v272_v2 = vld [vmem:[%s1497_s4] sm:$0x3]  ;;  %v263_v4 = vrot.slane %v258_v63, %v1444_v59  ;;  %v267_v7 = vrot.slane %v258_v63, %v1449_v61  ;;  %v1102_v63 = vld [vmem:[#allocation10 + $0x28] sm:$0xff]  }
  0x83   :  { %501 = vmatpush1.bf16.msra.mxu1 %v1047_v26  ;;  %v277_v11 = vrot.slane %v272_v2, %v1444_v59  ;;  %v281_v13 = vrot.slane %v272_v2, %v1449_v61  ;;  %v1089_v20 = vld [vmem:[#allocation8 + $0x60] sm:$0xff]   ;;  %v1095_v26 = vld [vmem:[#allocation8 + $0x78] sm:$0xff]  }
  0x84   :  { %226 = vmatpush1.bf16.msra.mxu0 %v210_v23  ;;  %502 = vmatprep.subr.bf16.mxu1 %v1048_v27  ;;  %v1090_v21 = vld [vmem:[#allocation8 + $0x20] sm:$0xff]   ;;  %v1092_v23 = vld [vmem:[#allocation8 + $0x28] sm:$0xff]   ;;  %v1096_v27 = vld [vmem:[#allocation8 + $0x38] sm:$0xff]  }
  0x85   :  { %951 = vmatprep.subr.bf16.mxu0 %v1081_v49  ;;  %v1097_v57 = vld [vmem:[#allocation10] sm:$0xff]  }
  0x87   :  { %892 = vmatmul.mubr.msk.bf16.vlgmr.msra.gmra.mrb[0].mxu0 %vm204_vm1, %v125_v25  ;;  %503 = vmatpush1.bf16.msra.mxu1 %v1050_v28  ;;  %v1094_v25 = vld [vmem:[#allocation8 + $0x30] sm:$0xff]   ;;  %v1280_v28 = vmov 0.0  }
  0x88   :  { %504 = vmatprep.subr.bf16.mxu1 %v1051_v29  ;;  %952 = vmatpush3.bf16.msra.mxu0 %v1082_v50  ;;  %v320_v29 = vld [vmem:[%s1499_s6] sm:$0x3] }
  0x89   :  { %953 = vmatprep.subr.bf16.mxu0 %v1083_v51 }
  0x8b   :  { %505 = vmatpush1.bf16.msra.mxu1 %v1053_v30  ;;  %v325_v30 = vrot.slane %v320_v29, %v1444_v59 }
  0x8c   :  { %506 = vmatprep.subr.bf16.mxu1 %v1054_v31  ;;  %954 = vmatpush3.bf16.msra.mxu0 %v1084_v52  ;;  %v535_v31 = vld [vmem:[%s1500_s7] sm:$0x3] }
  0x8d   :  { %955 = vmatprep.subr.bf16.mxu0 %v1085_v53 }
  0x8f   :  { %507 = vmatpush1.bf16.msra.mxu1 %v1056_v32  ;;  %v329_v32 = vrot.slane %v320_v29, %v1449_v61 }
  0x90   :  { %508 = vmatprep.subr.bf16.mxu1 %v1057_v33  ;;  %956 = vmatpush3.bf16.msra.mxu0 %v1086_v54 }
  0x91   :  { %957 = vmatprep.subr.bf16.mxu0 %v1087_v55 }
  0x93   :  { %509 = vmatpush1.bf16.msra.mxu1 %v1059_v34  ;;  %v549_v34 = vld [vmem:[%s1501_s8] sm:$0x3]  ;;  %s1282_s8 = smov [#allocation13]  }
  0x94   :  { %510 = vmatprep.subr.bf16.mxu1 %v1060_v35  ;;  %958 = vmatpush3.bf16.msra.mxu0 %v1088_v56  ;;  %s867_s5 = sshll.u32 %s1282_s8, 4  ;;  %s868_s5 = int_to_ptr.vmem [resolvable:$true] %s867_s5 }
  0x95   :  { %959 = vmatprep.subr.bf16.mxu0 %v1089_v20  ;;  %p1242_p7 = scmp.lt.s32.totalorder %s868_s5, %s868_s5 }
  0x97   :  { %511 = vmatpush1.bf16.msra.mxu1 %v1062_v36  ;;  %v540_v36 = vrot.slane %v535_v31, %v1444_v59 }
  0x98   :  { %512 = vmatprep.subr.bf16.mxu1 %v1063_v37  ;;  %960 = vmatpush3.bf16.msra.mxu0 %v1090_v21 }
  0x99   :  { %961 = vmatprep.subr.bf16.mxu0 %v1091_v22 }
  0x9b   :  { %513 = vmatpush1.bf16.msra.mxu1 %v1065_v38 }
  0x9c   :  { %514 = vmatprep.subr.bf16.mxu1 %v1066_v39  ;;  %962 = vmatpush3.bf16.msra.mxu0 %v1092_v23  ;;  %v544_v39 = vrot.slane %v535_v31, %v1449_v61 }
  0x9d   :  { %963 = vmatprep.subr.bf16.mxu0 %v1093_v24 }
  0x9f   :  { %515 = vmatpush1.bf16.msra.mxu1 %v1068_v40 }
  0xa0   :  { %516 = vmatprep.subr.bf16.mxu1 %v1069_v41  ;;  %964 = vmatpush3.bf16.msra.mxu0 %v1094_v25 }
  0xa1   :  { %965 = vmatprep.subr.bf16.mxu0 %v1095_v26 }
  0xa3   :  { %517 = vmatpush1.bf16.msra.mxu1 %v1071_v42  ;;  %v554_v42 = vrot.slane %v549_v34, %v1444_v59  ;;  %v1098_v59 = vld [vmem:[#allocation10 + $0x8] sm:$0xff]  }
  0xa4   :  { %518 = vmatprep.subr.bf16.mxu1 %v1072_v43  ;;  %966 = vmatpush3.bf16.msra.mxu0 %v1096_v27 }
  0xa5   :  { %982 = vmatprep.subr.bf16.mxu0 %v1280_v28 }
  0xa7   :  { %519 = vmatpush1.bf16.msra.mxu1 %v1074_v44 }
  0xa8   :  { %520 = vmatprep.subr.bf16.mxu1 %v1075_v45  ;;  %v558_v45 = vrot.slane %v549_v34, %v1449_v61  ;;  %v1100_v61 = vld [vmem:[#allocation10 + $0x18] sm:$0xff]  }
  0xab   :  { %521 = vmatpush1.bf16.msra.mxu1 %v1077_v46 }
  0xac   :  { %522 = vmatprep.subr.bf16.mxu1 %v1078_v47 }
  0xaf   :  { %523 = vmatpush1.bf16.msra.mxu1 %v1080_v48 }
 0x15a   :  { %v249_v1 = vpop.f32.mrb[0].mxu0 }
 0x15b   :  { %v250_v3 = vadd.f32 %v249_v1, %v142_v62  ;;  %v251_v5 = vpop.f32.mrb[1].mxu0  ;;  %v1101_v62 = vld [vmem:[#allocation10 + $0x20] sm:$0xff]   ;;  %v1104_v1 = vld [vmem:[#allocation10 + $0x38] sm:$0xff]  }
 0x15c   :  { %v252_v6 = vadd.f32 %v251_v5, %v146_v0  ;;  %v253_v8 = vpop.f32.mrb[2].mxu0  ;;  %v1103_v0 = vld [vmem:[#allocation10 + $0x30] sm:$0xff]  }
 0x15d   :  { %v256_v9 = vmax.f32 %v250_v3, 0.0  ;;  %v254_v10 = vpop.f32.mrb[3].mxu0  ;;  %v925_v3 = vld [vmem:[%s1503_s10] ss:$0 sm:$0xff]  ;;  %s1237_s10 = scalar_lea.vmem %s868_s5, 64 }
 0x15e   :  { %v257_v12 = vmax.f32 %v252_v6, 0.0  ;;  %p1238_p6 = scmp.ne.s32.totalorder %s868_s5, %s1237_s10  ;;  %p1243_p8 = scmp.lt.s32.totalorder %s1237_s10, %s1237_s10 }
 0x15f   :  { %v270_v14 = vmul.f32 %v263_v4, %v256_v9 }
 0x160   :  { %v271_v15 = vmul.f32 %v267_v7, %v257_v12  ;;  %p1244_p9 = por %p1243_p8, %p1242_p7 }
 0x161   :  { %v284_v16 = vadd.f32 %v277_v11, %v270_v14  ;;  %v942_v11 = vld [vmem:[#allocation11] ss:$0 sm:$0xff] }
 0x162   :  { %v285_v17 = vadd.f32 %v281_v13, %v271_v15  ;;  %p1245_p10 = pnand %p1244_p9, %p1238_p6 }
 0x163   :  { %v286_v19 = vpack.c.bf16 %v284_v16, %v284_v16 }
 0x164   :  { %v287_v18 = vpack.c.bf16 %v285_v17, %v285_v17 }
 0x165   :  { %v563_v48 = vunpack.c.l.bf16 %v286_v19 }
 0x166   :  { %524 = vmatprep.mubr.bf16.mxu1 %v287_v18  ;;  %v564_v50 = vunpack.c.l.bf16 %v287_v18 }
 0x167   :  { %525 = vmatmul.mubr.bf16.vlgmr.msra.gmra.mrb[0].mxu1 %v286_v19 }
 0x23a   :  { %v526_v33 = vpop.f32.mrb[0].mxu1 }
 0x23b   :  { %v527_v35 = vadd.f32 %v526_v33, %v325_v30  ;;  %v528_v37 = vpop.f32.mrb[1].mxu1 }
 0x23c   :  { %v529_v38 = vadd.f32 %v528_v37, %v329_v32  ;;  %v530_v40 = vpop.f32.mrb[2].mxu1 }
 0x23d   :  { %v533_v41 = vmax.f32 %v527_v35, 0.0  ;;  %v531_v43 = vpop.f32.mrb[3].mxu1 }
 0x23e   :  { %v534_v44 = vmax.f32 %v529_v38, 0.0 }
 0x23f   :  { %v547_v46 = vmul.f32 %v540_v36, %v533_v41 }
 0x240   :  { %v548_v47 = vmul.f32 %v544_v39, %v534_v44 }
 0x241   :  { %v561_v49 = vadd.f32 %v554_v42, %v547_v46 }
 0x242   :  { %v562_v51 = vadd.f32 %v558_v45, %v548_v47 }
 0x243   :  { %v565_v52 = vadd.f32 %v563_v48, %v561_v49 }
 0x244   :  { %v566_v53 = vadd.f32 %v564_v50, %v562_v51 }
 0x245   :  { %v567_v54 = vmax.f32 %v565_v52, 0.0 }
 0x246   :  { %v568_v55 = vmax.f32 %v566_v53, 0.0 }
 0x247   :  { %v569_v58 = vpack.c.bf16 %v567_v54, %v567_v54 }
 0x248   :  { %v570_v56 = vpack.c.bf16 %v568_v55, %v568_v55 }
 0x24a   :  { %738 = vmatprep.mubr.bf16.mxu0 %v570_v56 }
 0x24b   :  { %739 = vmatmul.mubr.bf16.vlgmr.msra.gmra.mrb[4].mxu0 %v569_v58 }
 0x24c   :  { %983 = vmatpush3.bf16.msra.mxu0 %v1097_v57  ;;  %998 = vmatprep.mubr.msk.bf16.mxu0 %vm1281_vm2, %v1280_v28 }
 0x24d   :  { %984 = vmatprep.subr.bf16.mxu0 %v1280_v28 }
 0x250   :  { %985 = vmatpush3.bf16.msra.mxu0 %v1098_v59 }
 0x251   :  { %986 = vmatprep.subr.bf16.mxu0 %v1280_v28 }
 0x254   :  { %987 = vmatpush3.bf16.msra.mxu0 %v1099_v60 }
 0x255   :  { %988 = vmatprep.subr.bf16.mxu0 %v1280_v28 }
 0x258   :  { %989 = vmatpush3.bf16.msra.mxu0 %v1100_v61 }
 0x259   :  { %990 = vmatprep.subr.bf16.mxu0 %v1280_v28 }
 0x25c   :  { %991 = vmatpush3.bf16.msra.mxu0 %v1101_v62 }
 0x25d   :  { %992 = vmatprep.subr.bf16.mxu0 %v1280_v28 }
 0x260   :  { %993 = vmatpush3.bf16.msra.mxu0 %v1102_v63 }
 0x261   :  { %994 = vmatprep.subr.bf16.mxu0 %v1280_v28 }
 0x264   :  { %995 = vmatpush3.bf16.msra.mxu0 %v1103_v0 }
 0x265   :  { %996 = vmatprep.subr.bf16.mxu0 %v1280_v28 }
 0x268   :  { %997 = vmatpush3.bf16.msra.mxu0 %v1104_v1 }
 0x31e   :  { %v967_v2 = vpop.f32.mrb[4].mxu0 }
 0x31f   :  { %v968_v4 = vpop.f32.mrb[5].mxu0 }
 0x320   :  { %v969_v5 = vadd.f32 %v968_v4, %v967_v2  ;;  %v970_v6 = vpop.f32.mrb[6].mxu0 }
 0x321   :  { %v971_v7 = vpop.f32.mrb[7].mxu0 }
 0x322   :  { %v741_v8 = vadd.f32 %v969_v5, %v925_v3 }
 0x324   :  { %v746_v9 = vmax.f32 %v741_v8, 0.0 }
 0x326   :  { %v747_v10 = vpack.c.bf16 %v746_v9, %v746_v9 }
 0x328   :  { %999 = vmatmul.mubr.bf16.vlgmr.msra.gmra.mrb[8].mxu0 %v747_v10 }
 0x3fb   :  { %v853_v12 = vpop.f32.mrb[8].mxu0 }
 0x3fc   :  { %v854_v13 = vadd.f32 %v942_v11, %v853_v12  ;;  %v1000_v14 = vpop.f32.mrb[9].mxu0 }
 0x3fd   :  { %v856_v15 = vpop.f32.mrb[10].mxu0 }
 0x3fe   :  { %v859_v16 = vpack.c.bf16 %v854_v13, %v854_v13  ;;  %v1001_v17 = vpop.f32.mrb[11].mxu0 }
 0x400   :  { %860 = vst [vmem:[#allocation13] sm:$0xf] %v859_v16 }
 0x401   :  { %1248 = shalt.err (!%p1245_p10)
}
 0x402   :  { %s1249_s24 = scalar_lea.hbm %s1506_s13, 64 }
 0x403   :  { %p1250_p11 = scmp.ne.s32.totalorder %s1506_s13, %s1249_s24  ;;  %p1253_p12 = scmp.lt.u32.totalorder %s1249_s24, %s1506_s13 }
 0x405   :  { %p1255_p13 = pnand %p1253_p12, %p1250_p11 }
 0x407   :  { %1258 = shalt.err (!%p1255_p13)
}
 0x408   :  { %870 = dma.vmem_to_hbm [thread:$0]  %s868_s5, 64, %s1506_s13, [#allocation4]  }
 0x409   :  { %1267 = dma.done.wait [#allocation4], 64  }
 0x40a   :  { %1268 = vsyncadd [#allocation4], 4294967232 }
 0x40b   :  { %874 = vsyncpa [#allocation3], 1 }
 0x40c   :  { %875 = vsyncpa [#allocation6], 1 }
 0x40d   :  { %876 = vsyncpa [#allocation9], 1 }
 0x40e   :  { %877 = vsyncpa [#allocation12], 1 }
 0x40f   :  { %878 = vsyncpa [#allocation4], 1 }

</bundles_post_ra>
